<compile_context>
chip_gen: v7x
topology: tpu7x:2x2x1
jax: 0.10.0
libtpu: 0.0.40
codegen_flags: <defaults>
</compile_context>

<pallas_src>
import numpy as np
import jax
import jax.numpy as jnp
from jax.experimental import pallas as pl
from jax.experimental.pallas import tpu as pltpu

_EPS = 1e-5
_TAPS = ((0, 0), (0, 1), (1, 0), (1, 1))  # (dh, dw) offsets of the 2x2 conv kernel


def interp_matrix(n_in, n_out):
    """Bilinear interpolation matrix matching nn.Upsample(align_corners=True)."""
    U = np.zeros((n_out, n_in), dtype=np.float32)
    if n_out == 1 or n_in == 1:
        U[:, 0] = 1.0
        return U
    scale = (n_in - 1) / (n_out - 1)
    for p in range(n_out):
        s = p * scale
        i0 = min(int(np.floor(s)), n_in - 1)
        i1 = min(i0 + 1, n_in - 1)
        w1 = np.float32(s - i0)
        U[p, i0] += np.float32(1.0) - w1
        U[p, i1] += w1
    return U


def upconv_forward(x_nchw, w_conv, b_conv, g1, b1, g2, b2):
    N, Cin, H, W = x_nchw.shape
    Cout = w_conv.shape[0]
    H2, W2 = 2 * H, 2 * W
    S1, S2 = H * W, H2 * W2
    R1, R2 = N * Cin, N * Cout            # activation / output rows (n*C + c)
    Rmax = max(R1, R2)
    inv_cnt = 1.0 / (N * S2)              # BN divisor (training-mode biased stats)

    # ---------------- wrapper-side constants & parameter packing ----------------
    # shared spatial upsample operator (batch/channels ride the matmul M axis), bf16 once
    UT = np.kron(interp_matrix(H, H2), interp_matrix(W, W2)).T            # (S1, S2)
    UT = jnp.asarray(UT, dtype=jnp.bfloat16)

    # conv weights: per-tap kron(I_N, W[:,:,dh,dw]) stacked along rows -> (4*R2, R1) bf16
    A = jnp.transpose(w_conv, (2, 3, 0, 1)).reshape(4, Cout, Cin)         # A[t, co, ci]
    eyeN = jnp.eye(N, dtype=w_conv.dtype)
    Wstk = jnp.concatenate([jnp.kron(eyeN, A[t]) for t in range(4)],
                           axis=0).astype(jnp.bfloat16)                   # (4*R2, R1)
    # NOTE: b_conv is deliberately NOT used by the kernel: training-mode BN2 subtracts the
    # per-channel mean right after the conv, so a per-channel constant cancels exactly.

    # per-row BN parameters packed into ONE (Rmax, 4) f32 operand: [g1 | b1 | g2 | b2]
    def _col(v, rows):
        c = jnp.tile(v.astype(jnp.float32), N)
        return jnp.pad(c, (0, Rmax - rows))
    prm = jnp.stack([_col(g1, R1), _col(b1, R1), _col(g2, R2), _col(b2, R2)], axis=1)

    # NCHW -> (N*Cin, H*W) is a pure reshape; the bf16 cast happens inside the kernel
    xf = x_nchw.reshape(R1, S1)

    def kernel(xf_ref, ut_ref, w_ref, prm_ref, o_ref):
        f32 = jnp.float32

        def batch_combine(vec, C, R):
            # per-channel sum across the batch, broadcast back to all (n*C + c) rows,
            # scaled by 1/(N*S2).  Tiny (R,R)x(R,1) dot; combine matrix built from iotas.
            ri = jax.lax.broadcasted_iota(jnp.int32, (R, R), 0)
            ci = jax.lax.broadcasted_iota(jnp.int32, (R, R), 1)
            G = jnp.where((ri % C) == (ci % C), inv_cnt, 0.0).astype(f32)
            return jnp.dot(G, vec, preferred_element_type=f32)            # (R, 1)

        pvals = prm_ref[...]                                              # (Rmax, 4)
        g1c, b1c = pvals[0:R1, 0:1], pvals[0:R1, 1:2]
        g2c, b2c = pvals[0:R2, 2:3], pvals[0:R2, 3:4]

        # (1) bilinear x2 upsample (align_corners=True): one lane-dense bf16 MXU matmul.
        xu = jnp.dot(xf_ref[...].astype(jnp.bfloat16), ut_ref[...],
                     preferred_element_type=f32)                          # (R1, S2)

        # (2) BN1 (training-mode batch stats): lane-reduce first, then tiny batch-combine.
        mu1 = batch_combine(jnp.sum(xu, axis=1, keepdims=True), Cin, R1)
        ex1 = batch_combine(jnp.sum(xu * xu, axis=1, keepdims=True), Cin, R1)
        sc1 = g1c * jax.lax.rsqrt(ex1 - mu1 * mu1 + _EPS)
        xn = (xu - mu1) * sc1 + b1c                                       # (R1, S2) f32

        # (3) Conv2d(k=2, padding='same' => zero-pad bottom/right): taps are lane rolls
        #     (XLU) masked at the bottom/right edges; each tap is consumed immediately by
        #     a small bf16 MXU matmul accumulated into y (keeps the vreg live set small).
        lane = jax.lax.broadcasted_iota(jnp.int32, (1, S2), 1)
        row_ok = lane < (H2 - 1) * W2              # h2 + 1 < H2
        col_ok = (lane % W2) < (W2 - 1)            # w2 + 1 < W2
        masks = (None, col_ok, row_ok, jnp.logical_and(row_ok, col_ok))

        y = None
        for t, (dh, dw) in enumerate(_TAPS):
            off = dh * W2 + dw
            tap = xn if off == 0 else pltpu.roll(xn, shift=S2 - off, axis=1)
            if masks[t] is not None:
                tap = jnp.where(masks[t], tap, 0.0)
            w_t = w_ref[t * R2:(t + 1) * R2, :]                           # (R2, R1) bf16
            contrib = jnp.dot(w_t, tap.astype(jnp.bfloat16),
                              preferred_element_type=f32)                 # (R2, S2)
            y = contrib if y is None else y + contrib

        # (4) BN2 (same reduce-then-combine scheme); output stays lane-dense f32.
        mu2 = batch_combine(jnp.sum(y, axis=1, keepdims=True), Cout, R2)
        ex2 = batch_combine(jnp.sum(y * y, axis=1, keepdims=True), Cout, R2)
        sc2 = g2c * jax.lax.rsqrt(ex2 - mu2 * mu2 + _EPS)
        o_ref[...] = (y - mu2) * sc2 + b2c

    vmem = pl.BlockSpec(memory_space=pltpu.MemorySpace.VMEM)
    out_flat = pl.pallas_call(
        kernel,
        out_shape=jax.ShapeDtypeStruct((R2, S2), jnp.float32),
        in_specs=[vmem] * 4,
        out_specs=vmem,
    )(xf, UT, Wstk, prm)

    # rows = n*Cout + co, lanes = h*W2 + w  ->  NCHW is a pure reshape
    return out_flat.reshape(N, Cout, H2, W2)


def reference(x_nchw, w_conv, b_conv, g1, b1, g2, b2):
    """Pure-JAX f32 reference of the same forward pass (NCHW throughout)."""
    N, Cin, H, W = x_nchw.shape
    H2, W2 = 2 * H, 2 * W
    hi = jax.lax.Precision.HIGHEST
    Uh = jnp.asarray(interp_matrix(H, H2))
    Uw = jnp.asarray(interp_matrix(W, W2))
    xu = jnp.einsum('ph,nchw->ncpw', Uh, x_nchw, precision=hi)
    xu = jnp.einsum('qw,ncpw->ncpq', Uw, xu, precision=hi)
    m1 = xu.mean(axis=(0, 2, 3), keepdims=True)
    v1 = jnp.square(xu - m1).mean(axis=(0, 2, 3), keepdims=True)
    xn = (xu - m1) / jnp.sqrt(v1 + _EPS) * g1.reshape(1, -1, 1, 1) + b1.reshape(1, -1, 1, 1)
    xp = jnp.pad(xn, ((0, 0), (0, 0), (0, 1), (0, 1)))  # padding='same', k=2: bottom/right
    co = jax.lax.conv_general_dilated(
        xp, w_conv, window_strides=(1, 1), padding='VALID',
        dimension_numbers=('NCHW', 'OIHW', 'NCHW'), precision=hi)
    co = co + b_conv.reshape(1, -1, 1, 1)
    m2 = co.mean(axis=(0, 2, 3), keepdims=True)
    v2 = jnp.square(co - m2).mean(axis=(0, 2, 3), keepdims=True)
    return (co - m2) / jnp.sqrt(v2 + _EPS) * g2.reshape(1, -1, 1, 1) + b2.reshape(1, -1, 1, 1)


if __name__ == "__main__":
    # UpConv(in_channels=4, out_channels=8) on a small batch (spatial 16 -> 32)
    N, Cin, Cout, H, W = 2, 4, 8, 16, 16
    key = jax.random.PRNGKey(0)
    ks = jax.random.split(key, 6)
    x = jax.random.normal(ks[0], (N, Cin, H, W), jnp.float32)
    w_conv = 0.25 * jax.random.normal(ks[1], (Cout, Cin, 2, 2), jnp.float32)
    b_conv = 0.10 * jax.random.normal(ks[2], (Cout,), jnp.float32)
    g1 = 1.0 + 0.1 * jax.random.normal(ks[3], (Cin,), jnp.float32)
    b1 = 0.1 * jax.random.normal(ks[4], (Cin,), jnp.float32)
    g2 = 1.0 + 0.1 * jax.random.normal(ks[5], (Cout,), jnp.float32)
    b2 = jnp.zeros((Cout,), jnp.float32)

    out = upconv_forward(x, w_conv, b_conv, g1, b1, g2, b2)
    out = jax.block_until_ready(out)
    assert out.shape == (N, Cout, 2 * H, 2 * W)

    ref = reference(x, w_conv, b_conv, g1, b1, g2, b2)
    # Kernel runs the matmuls on the bf16 MXU fast path; tolerance sized for bf16 operand
    # rounding vs. the exact f32 reference.
    np.testing.assert_allclose(np.asarray(out), np.asarray(ref), atol=3e-2, rtol=3e-2)
    print("KERNEL_OK")
</pallas_src>

<mosaic_0001>
module attributes {stable_mosaic.version = 11 : i64} {
  func.func @kernel(%arg0: memref<8x256xf32, #tpu.memory_space<vmem>>, %arg1: memref<256x1024xbf16, #tpu.memory_space<vmem>>, %arg2: memref<64x8xbf16, #tpu.memory_space<vmem>>, %arg3: memref<16x4xf32, #tpu.memory_space<vmem>>, %arg4: memref<16x1024xf32, #tpu.memory_space<vmem>>) attributes {dimension_semantics = [], scalar_prefetch = 0 : i64, scratch_operands = 0 : i64, tpu.core_type = #tpu.core_type<tc>} {
    %c0 = arith.constant 0 : index
    %c0_0 = arith.constant 0 : index
    %0 = vector.load %arg3[%c0, %c0_0] : memref<16x4xf32, #tpu.memory_space<vmem>>, vector<16x4xf32>
    %1 = vector.extract_strided_slice %0 {offsets = [0, 0], sizes = [8, 1], strides = [1, 1]} : vector<16x4xf32> to vector<8x1xf32>
    %2 = vector.extract_strided_slice %0 {offsets = [0, 1], sizes = [8, 1], strides = [1, 1]} : vector<16x4xf32> to vector<8x1xf32>
    %3 = vector.extract_strided_slice %0 {offsets = [0, 2], sizes = [16, 1], strides = [1, 1]} : vector<16x4xf32> to vector<16x1xf32>
    %4 = vector.extract_strided_slice %0 {offsets = [0, 3], sizes = [16, 1], strides = [1, 1]} : vector<16x4xf32> to vector<16x1xf32>
    %c0_1 = arith.constant 0 : index
    %c0_2 = arith.constant 0 : index
    %5 = vector.load %arg0[%c0_1, %c0_2] : memref<8x256xf32, #tpu.memory_space<vmem>>, vector<8x256xf32>
    %6 = arith.truncf %5 : vector<8x256xf32> to vector<8x256xbf16>
    %c0_3 = arith.constant 0 : index
    %c0_4 = arith.constant 0 : index
    %7 = vector.load %arg1[%c0_3, %c0_4] : memref<256x1024xbf16, #tpu.memory_space<vmem>>, vector<256x1024xbf16>
    %cst = arith.constant dense<0.000000e+00> : vector<8x1024xf32>
    %8 = tpu.matmul %6, %7, %cst {dimension_numbers = #tpu.dot_dimension_numbers<[1], [0], [0], [1], [0, 0, 1, 1], [], []>} : vector<8x256xbf16>, vector<256x1024xbf16>, vector<8x1024xf32> -> vector<8x1024xf32>
    %cst_5 = arith.constant dense<0.000000e+00> : vector<8xf32>
    %9 = vector.multi_reduction <add>, %8, %cst_5 [1] : vector<8x1024xf32> to vector<8xf32>
    %10 = vector.shape_cast %9 : vector<8xf32> to vector<8x1xf32>
    %11 = tpu.iota {dimensions = array<i32: 0>} : vector<8x8xi32>
    %12 = tpu.iota {dimensions = array<i32: 1>} : vector<8x8xi32>
    %c4_i32 = arith.constant 4 : i32
    %c0_i32 = arith.constant 0 : i32
    %13 = arith.cmpi eq, %c4_i32, %c0_i32 : i32
    %c1_i32 = arith.constant 1 : i32
    %14 = arith.select %13, %c1_i32, %c4_i32 : i32
    %15 = vector.broadcast %14 : i32 to vector<8x8xi32>
    %16 = arith.remsi %11, %15 : vector<8x8xi32>
    %c0_i32_6 = arith.constant 0 : i32
    %17 = vector.broadcast %c0_i32_6 : i32 to vector<8x8xi32>
    %18 = arith.cmpi ne, %16, %17 : vector<8x8xi32>
    %c0_i32_7 = arith.constant 0 : i32
    %19 = vector.broadcast %c0_i32_7 : i32 to vector<8x8xi32>
    %20 = arith.cmpi slt, %16, %19 : vector<8x8xi32>
    %c0_i32_8 = arith.constant 0 : i32
    %21 = arith.cmpi slt, %14, %c0_i32_8 : i32
    %22 = vector.broadcast %21 : i1 to vector<8x8xi1>
    %23 = vector.broadcast %22 : vector<8x8xi1> to vector<8x8xi1>
    %24 = arith.xori %20, %23 : vector<8x8xi1>
    %25 = arith.andi %24, %18 : vector<8x8xi1>
    %26 = vector.broadcast %14 : i32 to vector<8x8xi32>
    %27 = arith.addi %16, %26 : vector<8x8xi32>
    %28 = arith.select %25, %27, %16 : vector<8x8xi1>, vector<8x8xi32>
    %c4_i32_9 = arith.constant 4 : i32
    %c0_i32_10 = arith.constant 0 : i32
    %29 = arith.cmpi eq, %c4_i32_9, %c0_i32_10 : i32
    %c1_i32_11 = arith.constant 1 : i32
    %30 = arith.select %29, %c1_i32_11, %c4_i32_9 : i32
    %31 = vector.broadcast %30 : i32 to vector<8x8xi32>
    %32 = arith.remsi %12, %31 : vector<8x8xi32>
    %c0_i32_12 = arith.constant 0 : i32
    %33 = vector.broadcast %c0_i32_12 : i32 to vector<8x8xi32>
    %34 = arith.cmpi ne, %32, %33 : vector<8x8xi32>
    %c0_i32_13 = arith.constant 0 : i32
    %35 = vector.broadcast %c0_i32_13 : i32 to vector<8x8xi32>
    %36 = arith.cmpi slt, %32, %35 : vector<8x8xi32>
    %c0_i32_14 = arith.constant 0 : i32
    %37 = arith.cmpi slt, %30, %c0_i32_14 : i32
    %38 = vector.broadcast %37 : i1 to vector<8x8xi1>
    %39 = vector.broadcast %38 : vector<8x8xi1> to vector<8x8xi1>
    %40 = arith.xori %36, %39 : vector<8x8xi1>
    %41 = arith.andi %40, %34 : vector<8x8xi1>
    %42 = vector.broadcast %30 : i32 to vector<8x8xi32>
    %43 = arith.addi %32, %42 : vector<8x8xi32>
    %44 = arith.select %41, %43, %32 : vector<8x8xi1>, vector<8x8xi32>
    %45 = arith.cmpi eq, %28, %44 : vector<8x8xi32>
    %cst_15 = arith.constant 4.8828125E-4 : f32
    %cst_16 = arith.constant 0.000000e+00 : f32
    %46 = vector.broadcast %cst_15 : f32 to vector<8x8xf32>
    %47 = vector.broadcast %cst_16 : f32 to vector<8x8xf32>
    %48 = arith.select %45, %46, %47 : vector<8x8xi1>, vector<8x8xf32>
    %cst_17 = arith.constant dense<0.000000e+00> : vector<8x1xf32>
    %49 = tpu.matmul %48, %10, %cst_17 {dimension_numbers = #tpu.dot_dimension_numbers<[1], [0], [0], [1], [0, 0, 1, 1], [], []>} : vector<8x8xf32>, vector<8x1xf32>, vector<8x1xf32> -> vector<8x1xf32>
    %50 = arith.mulf %8, %8 : vector<8x1024xf32>
    %cst_18 = arith.constant dense<0.000000e+00> : vector<8xf32>
    %51 = vector.multi_reduction <add>, %50, %cst_18 [1] : vector<8x1024xf32> to vector<8xf32>
    %52 = vector.shape_cast %51 : vector<8xf32> to vector<8x1xf32>
    %53 = tpu.iota {dimensions = array<i32: 0>} : vector<8x8xi32>
    %54 = tpu.iota {dimensions = array<i32: 1>} : vector<8x8xi32>
    %c4_i32_19 = arith.constant 4 : i32
    %c0_i32_20 = arith.constant 0 : i32
    %55 = arith.cmpi eq, %c4_i32_19, %c0_i32_20 : i32
    %c1_i32_21 = arith.constant 1 : i32
    %56 = arith.select %55, %c1_i32_21, %c4_i32_19 : i32
    %57 = vector.broadcast %56 : i32 to vector<8x8xi32>
    %58 = arith.remsi %53, %57 : vector<8x8xi32>
    %c0_i32_22 = arith.constant 0 : i32
    %59 = vector.broadcast %c0_i32_22 : i32 to vector<8x8xi32>
    %60 = arith.cmpi ne, %58, %59 : vector<8x8xi32>
    %c0_i32_23 = arith.constant 0 : i32
    %61 = vector.broadcast %c0_i32_23 : i32 to vector<8x8xi32>
    %62 = arith.cmpi slt, %58, %61 : vector<8x8xi32>
    %c0_i32_24 = arith.constant 0 : i32
    %63 = arith.cmpi slt, %56, %c0_i32_24 : i32
    %64 = vector.broadcast %63 : i1 to vector<8x8xi1>
    %65 = vector.broadcast %64 : vector<8x8xi1> to vector<8x8xi1>
    %66 = arith.xori %62, %65 : vector<8x8xi1>
    %67 = arith.andi %66, %60 : vector<8x8xi1>
    %68 = vector.broadcast %56 : i32 to vector<8x8xi32>
    %69 = arith.addi %58, %68 : vector<8x8xi32>
    %70 = arith.select %67, %69, %58 : vector<8x8xi1>, vector<8x8xi32>
    %c4_i32_25 = arith.constant 4 : i32
    %c0_i32_26 = arith.constant 0 : i32
    %71 = arith.cmpi eq, %c4_i32_25, %c0_i32_26 : i32
    %c1_i32_27 = arith.constant 1 : i32
    %72 = arith.select %71, %c1_i32_27, %c4_i32_25 : i32
    %73 = vector.broadcast %72 : i32 to vector<8x8xi32>
    %74 = arith.remsi %54, %73 : vector<8x8xi32>
    %c0_i32_28 = arith.constant 0 : i32
    %75 = vector.broadcast %c0_i32_28 : i32 to vector<8x8xi32>
    %76 = arith.cmpi ne, %74, %75 : vector<8x8xi32>
    %c0_i32_29 = arith.constant 0 : i32
    %77 = vector.broadcast %c0_i32_29 : i32 to vector<8x8xi32>
    %78 = arith.cmpi slt, %74, %77 : vector<8x8xi32>
    %c0_i32_30 = arith.constant 0 : i32
    %79 = arith.cmpi slt, %72, %c0_i32_30 : i32
    %80 = vector.broadcast %79 : i1 to vector<8x8xi1>
    %81 = vector.broadcast %80 : vector<8x8xi1> to vector<8x8xi1>
    %82 = arith.xori %78, %81 : vector<8x8xi1>
    %83 = arith.andi %82, %76 : vector<8x8xi1>
    %84 = vector.broadcast %72 : i32 to vector<8x8xi32>
    %85 = arith.addi %74, %84 : vector<8x8xi32>
    %86 = arith.select %83, %85, %74 : vector<8x8xi1>, vector<8x8xi32>
    %87 = arith.cmpi eq, %70, %86 : vector<8x8xi32>
    %cst_31 = arith.constant 4.8828125E-4 : f32
    %cst_32 = arith.constant 0.000000e+00 : f32
    %88 = vector.broadcast %cst_31 : f32 to vector<8x8xf32>
    %89 = vector.broadcast %cst_32 : f32 to vector<8x8xf32>
    %90 = arith.select %87, %88, %89 : vector<8x8xi1>, vector<8x8xf32>
    %cst_33 = arith.constant dense<0.000000e+00> : vector<8x1xf32>
    %91 = tpu.matmul %90, %52, %cst_33 {dimension_numbers = #tpu.dot_dimension_numbers<[1], [0], [0], [1], [0, 0, 1, 1], [], []>} : vector<8x8xf32>, vector<8x1xf32>, vector<8x1xf32> -> vector<8x1xf32>
    %92 = arith.mulf %49, %49 : vector<8x1xf32>
    %93 = arith.subf %91, %92 : vector<8x1xf32>
    %cst_34 = arith.constant 9.99999974E-6 : f32
    %94 = vector.broadcast %cst_34 : f32 to vector<8x1xf32>
    %95 = arith.addf %93, %94 : vector<8x1xf32>
    %96 = math.rsqrt %95 : vector<8x1xf32>
    %97 = arith.mulf %1, %96 : vector<8x1xf32>
    %98 = vector.broadcast %49 : vector<8x1xf32> to vector<8x1024xf32>
    %99 = arith.subf %8, %98 : vector<8x1024xf32>
    %100 = vector.broadcast %97 : vector<8x1xf32> to vector<8x1024xf32>
    %101 = arith.mulf %99, %100 : vector<8x1024xf32>
    %102 = vector.broadcast %2 : vector<8x1xf32> to vector<8x1024xf32>
    %103 = arith.addf %101, %102 : vector<8x1024xf32>
    %104 = tpu.iota {dimensions = array<i32: 1>} : vector<1x1024xi32>
    %c992_i32 = arith.constant 992 : i32
    %105 = vector.broadcast %c992_i32 : i32 to vector<1x1024xi32>
    %106 = arith.cmpi slt, %104, %105 : vector<1x1024xi32>
    %c32_i32 = arith.constant 32 : i32
    %c0_i32_35 = arith.constant 0 : i32
    %107 = arith.cmpi eq, %c32_i32, %c0_i32_35 : i32
    %c1_i32_36 = arith.constant 1 : i32
    %108 = arith.select %107, %c1_i32_36, %c32_i32 : i32
    %109 = vector.broadcast %108 : i32 to vector<1x1024xi32>
    %110 = arith.remsi %104, %109 : vector<1x1024xi32>
    %c0_i32_37 = arith.constant 0 : i32
    %111 = vector.broadcast %c0_i32_37 : i32 to vector<1x1024xi32>
    %112 = arith.cmpi ne, %110, %111 : vector<1x1024xi32>
    %c0_i32_38 = arith.constant 0 : i32
    %113 = vector.broadcast %c0_i32_38 : i32 to vector<1x1024xi32>
    %114 = arith.cmpi slt, %110, %113 : vector<1x1024xi32>
    %c0_i32_39 = arith.constant 0 : i32
    %115 = arith.cmpi slt, %108, %c0_i32_39 : i32
    %116 = vector.broadcast %115 : i1 to vector<1x1024xi1>
    %117 = vector.broadcast %116 : vector<1x1024xi1> to vector<1x1024xi1>
    %118 = arith.xori %114, %117 : vector<1x1024xi1>
    %119 = arith.andi %118, %112 : vector<1x1024xi1>
    %120 = vector.broadcast %108 : i32 to vector<1x1024xi32>
    %121 = arith.addi %110, %120 : vector<1x1024xi32>
    %122 = arith.select %119, %121, %110 : vector<1x1024xi1>, vector<1x1024xi32>
    %c31_i32 = arith.constant 31 : i32
    %123 = vector.broadcast %c31_i32 : i32 to vector<1x1024xi32>
    %124 = arith.cmpi slt, %122, %123 : vector<1x1024xi32>
    %125 = arith.andi %106, %124 : vector<1x1024xi1>
    %c0_40 = arith.constant 0 : index
    %c0_41 = arith.constant 0 : index
    %126 = vector.load %arg2[%c0_40, %c0_41] : memref<64x8xbf16, #tpu.memory_space<vmem>>, vector<16x8xbf16>
    %127 = arith.truncf %103 : vector<8x1024xf32> to vector<8x1024xbf16>
    %cst_42 = arith.constant dense<0.000000e+00> : vector<16x1024xf32>
    %128 = tpu.matmul %126, %127, %cst_42 {dimension_numbers = #tpu.dot_dimension_numbers<[1], [0], [0], [1], [0, 0, 1, 1], [], []>} : vector<16x8xbf16>, vector<8x1024xbf16>, vector<16x1024xf32> -> vector<16x1024xf32>
    %c1023_i32 = arith.constant 1023 : i32
    %129 = tpu.dynamic_rotate %103 by %c1023_i32 dim 1 : vector<8x1024xf32>, i32 -> vector<8x1024xf32>
    %cst_43 = arith.constant 0.000000e+00 : f32
    %130 = vector.shape_cast %124 : vector<1x1024xi1> to vector<1x1024xi1>
    %131 = vector.broadcast %130 : vector<1x1024xi1> to vector<8x1024xi1>
    %132 = vector.broadcast %cst_43 : f32 to vector<8x1024xf32>
    %133 = arith.select %131, %129, %132 : vector<8x1024xi1>, vector<8x1024xf32>
    %c16 = arith.constant 16 : index
    %c0_44 = arith.constant 0 : index
    %134 = vector.load %arg2[%c16, %c0_44] : memref<64x8xbf16, #tpu.memory_space<vmem>>, vector<16x8xbf16>
    %135 = arith.truncf %133 : vector<8x1024xf32> to vector<8x1024xbf16>
    %cst_45 = arith.constant dense<0.000000e+00> : vector<16x1024xf32>
    %136 = tpu.matmul %134, %135, %cst_45 {dimension_numbers = #tpu.dot_dimension_numbers<[1], [0], [0], [1], [0, 0, 1, 1], [], []>} : vector<16x8xbf16>, vector<8x1024xbf16>, vector<16x1024xf32> -> vector<16x1024xf32>
    %137 = arith.addf %128, %136 : vector<16x1024xf32>
    %c992_i32_46 = arith.constant 992 : i32
    %138 = tpu.dynamic_rotate %103 by %c992_i32_46 dim 1 : vector<8x1024xf32>, i32 -> vector<8x1024xf32>
    %cst_47 = arith.constant 0.000000e+00 : f32
    %139 = vector.shape_cast %106 : vector<1x1024xi1> to vector<1x1024xi1>
    %140 = vector.broadcast %139 : vector<1x1024xi1> to vector<8x1024xi1>
    %141 = vector.broadcast %cst_47 : f32 to vector<8x1024xf32>
    %142 = arith.select %140, %138, %141 : vector<8x1024xi1>, vector<8x1024xf32>
    %c32 = arith.constant 32 : index
    %c0_48 = arith.constant 0 : index
    %143 = vector.load %arg2[%c32, %c0_48] : memref<64x8xbf16, #tpu.memory_space<vmem>>, vector<16x8xbf16>
    %144 = arith.truncf %142 : vector<8x1024xf32> to vector<8x1024xbf16>
    %cst_49 = arith.constant dense<0.000000e+00> : vector<16x1024xf32>
    %145 = tpu.matmul %143, %144, %cst_49 {dimension_numbers = #tpu.dot_dimension_numbers<[1], [0], [0], [1], [0, 0, 1, 1], [], []>} : vector<16x8xbf16>, vector<8x1024xbf16>, vector<16x1024xf32> -> vector<16x1024xf32>
    %146 = arith.addf %137, %145 : vector<16x1024xf32>
    %c991_i32 = arith.constant 991 : i32
    %147 = tpu.dynamic_rotate %103 by %c991_i32 dim 1 : vector<8x1024xf32>, i32 -> vector<8x1024xf32>
    %cst_50 = arith.constant 0.000000e+00 : f32
    %148 = vector.shape_cast %125 : vector<1x1024xi1> to vector<1x1024xi1>
    %149 = vector.broadcast %148 : vector<1x1024xi1> to vector<8x1024xi1>
    %150 = vector.broadcast %cst_50 : f32 to vector<8x1024xf32>
    %151 = arith.select %149, %147, %150 : vector<8x1024xi1>, vector<8x1024xf32>
    %c48 = arith.constant 48 : index
    %c0_51 = arith.constant 0 : index
    %152 = vector.load %arg2[%c48, %c0_51] : memref<64x8xbf16, #tpu.memory_space<vmem>>, vector<16x8xbf16>
    %153 = arith.truncf %151 : vector<8x1024xf32> to vector<8x1024xbf16>
    %cst_52 = arith.constant dense<0.000000e+00> : vector<16x1024xf32>
    %154 = tpu.matmul %152, %153, %cst_52 {dimension_numbers = #tpu.dot_dimension_numbers<[1], [0], [0], [1], [0, 0, 1, 1], [], []>} : vector<16x8xbf16>, vector<8x1024xbf16>, vector<16x1024xf32> -> vector<16x1024xf32>
    %155 = arith.addf %146, %154 : vector<16x1024xf32>
    %cst_53 = arith.constant dense<0.000000e+00> : vector<16xf32>
    %156 = vector.multi_reduction <add>, %155, %cst_53 [1] : vector<16x1024xf32> to vector<16xf32>
    %157 = vector.shape_cast %156 : vector<16xf32> to vector<16x1xf32>
    %158 = tpu.iota {dimensions = array<i32: 0>} : vector<16x16xi32>
    %159 = tpu.iota {dimensions = array<i32: 1>} : vector<16x16xi32>
    %c8_i32 = arith.constant 8 : i32
    %c0_i32_54 = arith.constant 0 : i32
    %160 = arith.cmpi eq, %c8_i32, %c0_i32_54 : i32
    %c1_i32_55 = arith.constant 1 : i32
    %161 = arith.select %160, %c1_i32_55, %c8_i32 : i32
    %162 = vector.broadcast %161 : i32 to vector<16x16xi32>
    %163 = arith.remsi %158, %162 : vector<16x16xi32>
    %c0_i32_56 = arith.constant 0 : i32
    %164 = vector.broadcast %c0_i32_56 : i32 to vector<16x16xi32>
    %165 = arith.cmpi ne, %163, %164 : vector<16x16xi32>
    %c0_i32_57 = arith.constant 0 : i32
    %166 = vector.broadcast %c0_i32_57 : i32 to vector<16x16xi32>
    %167 = arith.cmpi slt, %163, %166 : vector<16x16xi32>
    %c0_i32_58 = arith.constant 0 : i32
    %168 = arith.cmpi slt, %161, %c0_i32_58 : i32
    %169 = vector.broadcast %168 : i1 to vector<16x16xi1>
    %170 = vector.broadcast %169 : vector<16x16xi1> to vector<16x16xi1>
    %171 = arith.xori %167, %170 : vector<16x16xi1>
    %172 = arith.andi %171, %165 : vector<16x16xi1>
    %173 = vector.broadcast %161 : i32 to vector<16x16xi32>
    %174 = arith.addi %163, %173 : vector<16x16xi32>
    %175 = arith.select %172, %174, %163 : vector<16x16xi1>, vector<16x16xi32>
    %c8_i32_59 = arith.constant 8 : i32
    %c0_i32_60 = arith.constant 0 : i32
    %176 = arith.cmpi eq, %c8_i32_59, %c0_i32_60 : i32
    %c1_i32_61 = arith.constant 1 : i32
    %177 = arith.select %176, %c1_i32_61, %c8_i32_59 : i32
    %178 = vector.broadcast %177 : i32 to vector<16x16xi32>
    %179 = arith.remsi %159, %178 : vector<16x16xi32>
    %c0_i32_62 = arith.constant 0 : i32
    %180 = vector.broadcast %c0_i32_62 : i32 to vector<16x16xi32>
    %181 = arith.cmpi ne, %179, %180 : vector<16x16xi32>
    %c0_i32_63 = arith.constant 0 : i32
    %182 = vector.broadcast %c0_i32_63 : i32 to vector<16x16xi32>
    %183 = arith.cmpi slt, %179, %182 : vector<16x16xi32>
    %c0_i32_64 = arith.constant 0 : i32
    %184 = arith.cmpi slt, %177, %c0_i32_64 : i32
    %185 = vector.broadcast %184 : i1 to vector<16x16xi1>
    %186 = vector.broadcast %185 : vector<16x16xi1> to vector<16x16xi1>
    %187 = arith.xori %183, %186 : vector<16x16xi1>
    %188 = arith.andi %187, %181 : vector<16x16xi1>
    %189 = vector.broadcast %177 : i32 to vector<16x16xi32>
    %190 = arith.addi %179, %189 : vector<16x16xi32>
    %191 = arith.select %188, %190, %179 : vector<16x16xi1>, vector<16x16xi32>
    %192 = arith.cmpi eq, %175, %191 : vector<16x16xi32>
    %cst_65 = arith.constant 4.8828125E-4 : f32
    %cst_66 = arith.constant 0.000000e+00 : f32
    %193 = vector.broadcast %cst_65 : f32 to vector<16x16xf32>
    %194 = vector.broadcast %cst_66 : f32 to vector<16x16xf32>
    %195 = arith.select %192, %193, %194 : vector<16x16xi1>, vector<16x16xf32>
    %cst_67 = arith.constant dense<0.000000e+00> : vector<16x1xf32>
    %196 = tpu.matmul %195, %157, %cst_67 {dimension_numbers = #tpu.dot_dimension_numbers<[1], [0], [0], [1], [0, 0, 1, 1], [], []>} : vector<16x16xf32>, vector<16x1xf32>, vector<16x1xf32> -> vector<16x1xf32>
    %197 = arith.mulf %155, %155 : vector<16x1024xf32>
    %cst_68 = arith.constant dense<0.000000e+00> : vector<16xf32>
    %198 = vector.multi_reduction <add>, %197, %cst_68 [1] : vector<16x1024xf32> to vector<16xf32>
    %199 = vector.shape_cast %198 : vector<16xf32> to vector<16x1xf32>
    %200 = tpu.iota {dimensions = array<i32: 0>} : vector<16x16xi32>
    %201 = tpu.iota {dimensions = array<i32: 1>} : vector<16x16xi32>
    %c8_i32_69 = arith.constant 8 : i32
    %c0_i32_70 = arith.constant 0 : i32
    %202 = arith.cmpi eq, %c8_i32_69, %c0_i32_70 : i32
    %c1_i32_71 = arith.constant 1 : i32
    %203 = arith.select %202, %c1_i32_71, %c8_i32_69 : i32
    %204 = vector.broadcast %203 : i32 to vector<16x16xi32>
    %205 = arith.remsi %200, %204 : vector<16x16xi32>
    %c0_i32_72 = arith.constant 0 : i32
    %206 = vector.broadcast %c0_i32_72 : i32 to vector<16x16xi32>
    %207 = arith.cmpi ne, %205, %206 : vector<16x16xi32>
    %c0_i32_73 = arith.constant 0 : i32
    %208 = vector.broadcast %c0_i32_73 : i32 to vector<16x16xi32>
    %209 = arith.cmpi slt, %205, %208 : vector<16x16xi32>
    %c0_i32_74 = arith.constant 0 : i32
    %210 = arith.cmpi slt, %203, %c0_i32_74 : i32
    %211 = vector.broadcast %210 : i1 to vector<16x16xi1>
    %212 = vector.broadcast %211 : vector<16x16xi1> to vector<16x16xi1>
    %213 = arith.xori %209, %212 : vector<16x16xi1>
    %214 = arith.andi %213, %207 : vector<16x16xi1>
    %215 = vector.broadcast %203 : i32 to vector<16x16xi32>
    %216 = arith.addi %205, %215 : vector<16x16xi32>
    %217 = arith.select %214, %216, %205 : vector<16x16xi1>, vector<16x16xi32>
    %c8_i32_75 = arith.constant 8 : i32
    %c0_i32_76 = arith.constant 0 : i32
    %218 = arith.cmpi eq, %c8_i32_75, %c0_i32_76 : i32
    %c1_i32_77 = arith.constant 1 : i32
    %219 = arith.select %218, %c1_i32_77, %c8_i32_75 : i32
    %220 = vector.broadcast %219 : i32 to vector<16x16xi32>
    %221 = arith.remsi %201, %220 : vector<16x16xi32>
    %c0_i32_78 = arith.constant 0 : i32
    %222 = vector.broadcast %c0_i32_78 : i32 to vector<16x16xi32>
    %223 = arith.cmpi ne, %221, %222 : vector<16x16xi32>
    %c0_i32_79 = arith.constant 0 : i32
    %224 = vector.broadcast %c0_i32_79 : i32 to vector<16x16xi32>
    %225 = arith.cmpi slt, %221, %224 : vector<16x16xi32>
    %c0_i32_80 = arith.constant 0 : i32
    %226 = arith.cmpi slt, %219, %c0_i32_80 : i32
    %227 = vector.broadcast %226 : i1 to vector<16x16xi1>
    %228 = vector.broadcast %227 : vector<16x16xi1> to vector<16x16xi1>
    %229 = arith.xori %225, %228 : vector<16x16xi1>
    %230 = arith.andi %229, %223 : vector<16x16xi1>
    %231 = vector.broadcast %219 : i32 to vector<16x16xi32>
    %232 = arith.addi %221, %231 : vector<16x16xi32>
    %233 = arith.select %230, %232, %221 : vector<16x16xi1>, vector<16x16xi32>
    %234 = arith.cmpi eq, %217, %233 : vector<16x16xi32>
    %cst_81 = arith.constant 4.8828125E-4 : f32
    %cst_82 = arith.constant 0.000000e+00 : f32
    %235 = vector.broadcast %cst_81 : f32 to vector<16x16xf32>
    %236 = vector.broadcast %cst_82 : f32 to vector<16x16xf32>
    %237 = arith.select %234, %235, %236 : vector<16x16xi1>, vector<16x16xf32>
    %cst_83 = arith.constant dense<0.000000e+00> : vector<16x1xf32>
    %238 = tpu.matmul %237, %199, %cst_83 {dimension_numbers = #tpu.dot_dimension_numbers<[1], [0], [0], [1], [0, 0, 1, 1], [], []>} : vector<16x16xf32>, vector<16x1xf32>, vector<16x1xf32> -> vector<16x1xf32>
    %239 = arith.mulf %196, %196 : vector<16x1xf32>
    %240 = arith.subf %238, %239 : vector<16x1xf32>
    %cst_84 = arith.constant 9.99999974E-6 : f32
    %241 = vector.broadcast %cst_84 : f32 to vector<16x1xf32>
    %242 = arith.addf %240, %241 : vector<16x1xf32>
    %243 = math.rsqrt %242 : vector<16x1xf32>
    %244 = arith.mulf %3, %243 : vector<16x1xf32>
    %245 = vector.broadcast %196 : vector<16x1xf32> to vector<16x1024xf32>
    %246 = arith.subf %155, %245 : vector<16x1024xf32>
    %247 = vector.broadcast %244 : vector<16x1xf32> to vector<16x1024xf32>
    %248 = arith.mulf %246, %247 : vector<16x1024xf32>
    %249 = vector.broadcast %4 : vector<16x1xf32> to vector<16x1024xf32>
    %250 = arith.addf %248, %249 : vector<16x1024xf32>
    %c0_85 = arith.constant 0 : index
    %c0_86 = arith.constant 0 : index
    %251 = vector.load %arg4[%c0_85, %c0_86] : memref<16x1024xf32, #tpu.memory_space<vmem>>, vector<16x1024xf32>
    tpu.vector_store %arg4[%c0_85, %c0_86], %250 {strides = array<i32>} : memref<16x1024xf32, #tpu.memory_space<vmem>>, vector<16x1024xf32>,
    return
  }
}

</mosaic_0001>

<bundles_post_ra>
// kernel: tpu_custom_call.1
= control target key start
LH: loop header
LB: loop body
LE: loop exit
PB: predicated region body
PF: predicated region fallthrough
CT: control target
= control target key end

     0   :  { %9 = vsyncpa [#allocation3], 0  ;;  %s3666_s0 = inlined_call_operand.vmem [shape: f32[8,256], index: 0, kind: input, shape index: {}]   ;;  %s3667_s1 = inlined_call_operand.hbm [shape: bf16[256,1024], index: 1, kind: input, shape index: {}]   ;;  %s3668_s2 = inlined_call_operand.vmem [shape: bf16[64,8], index: 2, kind: input, shape index: {}]   ;;  %s3669_s3 = inlined_call_operand.vmem [shape: f32[16,4], index: 3, kind: input, shape index: {}]   ;;  %s3670_s4 = inlined_call_operand.hbm [shape: f32[16,1024], index: 4, kind: output, shape index: {}]  }
   0x1   :  { %10 = vsyncpa [#allocation4], 0  ;;  %s3148_s15 = smov [#allocation2]   ;;  %s3100_s19 = scalar_lea.hbm %s3667_s1, 16384 }
   0x2   :  { %s18_s16 = sshll.u32 %s3148_s15, 4  ;;  %p3101_p0 = scmp.ne.s32.totalorder %s3667_s1, %s3100_s19  ;;  %s19_s16 = int_to_ptr.vmem [resolvable:$true] %s18_s16 }
   0x3   :  { %p3104_p1 = scmp.lt.u32.totalorder %s3100_s19, %s3667_s1 }
   0x5   :  { %p3106_p2 = pnand %p3104_p1, %p3101_p0 }
   0x7   :  { %3109 = shalt.err (!%p3106_p2)
}
   0x8   :  { %s3110_s24 = scalar_lea.vmem %s19_s16, 16384  ;;  %p3115_p4 = scmp.lt.s32.totalorder %s19_s16, %s19_s16 }
   0x9   :  { %p3111_p3 = scmp.ne.s32.totalorder %s19_s16, %s3110_s24  ;;  %p3116_p5 = scmp.lt.s32.totalorder %s3110_s24, %s3110_s24 }
   0xb   :  { %p3117_p6 = por %p3116_p5, %p3115_p4 }
   0xd   :  { %p3118_p7 = pnand %p3117_p6, %p3111_p3 }
   0xf   :  { %3121 = shalt.err (!%p3118_p7)
}
  0x10   :  { %s3149_s25 = smov 512   ;;  %s3150_s26 = smov 32  }
  0x11   :  { %24 = dma.hbm_to_vmem [thread:$0]  %s3667_s1, 16384, %s19_s16, [#allocation3], %s3149_s25, %s3149_s25, %s3150_s26  }
  0x12   :  { %3144 = dma.done.wait [#allocation3], 16384  }
  0x13   :  { %3145 = vsyncadd [#allocation3], 4294950912  ;;  %v39_v0 = vld [vmem:[#allocation2] sm:$0xff]  ;;  %v40_v2 = vld [vmem:[#allocation2 + $0x8] sm:$0xff]  ;;  %vm3152_vm0 = vmmov 0   ;;  %vm1010_vm2 = vcmask 64512  }
  0x14   :  { %v43_v1 = vld [vmem:[#allocation2 + $0x20] sm:$0xff]  ;;  %v44_v5 = vld [vmem:[#allocation2 + $0x28] sm:$0xff]  ;;  %s3155_s7 = smov 95   ;;  %s3156_s8 = smov 127   ;;  %vm1419_vm6 = vcmask 1043456  }
  0x15   :  { %v2757_v3 = vcombine.high %v39_v0, %v43_v1  ;;  %v2756_v4 = vcombine.low %v39_v0, %v43_v1  ;;  %v47_v6 = vld [vmem:[#allocation2 + $0x40] sm:$0xff]  ;;  %v2759_v8 = vcombine.high %v40_v2, %v44_v5  ;;  %v2758_v9 = vcombine.low %v40_v2, %v44_v5  ;;  %v48_v11 = vld [vmem:[#allocation2 + $0x48] sm:$0xff]  ;;  %s3157_s9 = smov 96  }
  0x16   :  { %v51_v7 = vld [vmem:[#allocation2 + $0x60] sm:$0xff]  ;;  %v52_v12 = vld [vmem:[#allocation2 + $0x68] sm:$0xff] }
  0x17   :  { %v2765_v10 = vcombine.high %v47_v6, %v51_v7  ;;  %v55_v13 = vld [vmem:[#allocation2 + $0x80] sm:$0xff]  ;;  %807 = vmatprep.subr.bf16.mxu0 %v2757_v3  ;;  %v2767_v14 = vcombine.high %v48_v11, %v52_v12  ;;  %v56_v16 = vld [vmem:[#allocation2 + $0x88] sm:$0xff]  ;;  %848 = vmatprep.subr.bf16.mxu1 %v2759_v8  ;;  %v2764_v18 = vcombine.low %v47_v6, %v51_v7 }
  0x18   :  { %v59_v15 = vld [vmem:[#allocation2 + $0xa0] sm:$0xff]  ;;  %v60_v17 = vld [vmem:[#allocation2 + $0xa8] sm:$0xff]  ;;  %808 = vmatpush1.bf16.msra.mxu0 %v2756_v4  ;;  %849 = vmatpush1.bf16.msra.mxu1 %v2758_v9  ;;  %v2766_v19 = vcombine.low %v48_v11, %v52_v12 }
  0x19   :  { %809 = vmatprep.subr.bf16.mxu0 %v2765_v10  ;;  %v2773_v20 = vcombine.high %v55_v13, %v59_v15  ;;  %850 = vmatprep.subr.bf16.mxu1 %v2767_v14  ;;  %v2775_v21 = vcombine.high %v56_v16, %v60_v17  ;;  %v63_v22 = vld [vmem:[#allocation2 + $0xc0] sm:$0xff]  ;;  %v64_v24 = vld [vmem:[#allocation2 + $0xc8] sm:$0xff]  ;;  %v2772_v26 = vcombine.low %v55_v13, %v59_v15 }
  0x1a   :  { %v67_v23 = vld [vmem:[#allocation2 + $0xe0] sm:$0xff]  ;;  %v68_v25 = vld [vmem:[#allocation2 + $0xe8] sm:$0xff]  ;;  %v2774_v27 = vcombine.low %v56_v16, %v60_v17 }
  0x1b   :  { %v2781_v28 = vcombine.high %v63_v22, %v67_v23  ;;  %v2783_v29 = vcombine.high %v64_v24, %v68_v25  ;;  %v71_v30 = vld [vmem:[#allocation2 + $0x100] sm:$0xff]  ;;  %v72_v32 = vld [vmem:[#allocation2 + $0x108] sm:$0xff]  ;;  %v2780_v34 = vcombine.low %v63_v22, %v67_v23  ;;  %v2782_v35 = vcombine.low %v64_v24, %v68_v25 }
  0x1c   :  { %810 = vmatpush1.bf16.msra.mxu0 %v2764_v18  ;;  %851 = vmatpush1.bf16.msra.mxu1 %v2766_v19  ;;  %v75_v31 = vld [vmem:[#allocation2 + $0x120] sm:$0xff]  ;;  %v76_v33 = vld [vmem:[#allocation2 + $0x128] sm:$0xff] }
  0x1d   :  { %811 = vmatprep.subr.bf16.mxu0 %v2773_v20  ;;  %852 = vmatprep.subr.bf16.mxu1 %v2775_v21  ;;  %v2789_v36 = vcombine.high %v71_v30, %v75_v31  ;;  %v2791_v37 = vcombine.high %v72_v32, %v76_v33  ;;  %v79_v38 = vld [vmem:[#allocation2 + $0x140] sm:$0xff]  ;;  %v80_v40 = vld [vmem:[#allocation2 + $0x148] sm:$0xff]  ;;  %v2788_v42 = vcombine.low %v71_v30, %v75_v31 }
  0x1e   :  { %v83_v39 = vld [vmem:[#allocation2 + $0x160] sm:$0xff]  ;;  %v84_v41 = vld [vmem:[#allocation2 + $0x168] sm:$0xff]  ;;  %v2790_v43 = vcombine.low %v72_v32, %v76_v33 }
  0x1f   :  { %v2797_v44 = vcombine.high %v79_v38, %v83_v39  ;;  %v2799_v45 = vcombine.high %v80_v40, %v84_v41  ;;  %v87_v46 = vld [vmem:[#allocation2 + $0x180] sm:$0xff]  ;;  %v88_v48 = vld [vmem:[#allocation2 + $0x188] sm:$0xff]  ;;  %v2796_v50 = vcombine.low %v79_v38, %v83_v39  ;;  %v2798_v51 = vcombine.low %v80_v40, %v84_v41 }
  0x20   :  { %812 = vmatpush1.bf16.msra.mxu0 %v2772_v26  ;;  %853 = vmatpush1.bf16.msra.mxu1 %v2774_v27  ;;  %v91_v47 = vld [vmem:[#allocation2 + $0x1a0] sm:$0xff]  ;;  %v92_v49 = vld [vmem:[#allocation2 + $0x1a8] sm:$0xff] }
  0x21   :  { %813 = vmatprep.subr.bf16.mxu0 %v2781_v28  ;;  %854 = vmatprep.subr.bf16.mxu1 %v2783_v29  ;;  %v2805_v52 = vcombine.high %v87_v46, %v91_v47  ;;  %v36_v53 = vld [vmem:[%s3666_s0 + $0x8] sm:$0xff]  ;;  %v2807_v54 = vcombine.high %v88_v48, %v92_v49  ;;  %v95_v55 = vld [vmem:[#allocation2 + $0x1c0] sm:$0xff]  ;;  %v2804_v60 = vcombine.low %v87_v46, %v91_v47 }
  0x22   :  { %v99_v56 = vld [vmem:[#allocation2 + $0x1e0] sm:$0xff]  ;;  %v3204_v57 = vpack.c.bf16 %v36_v53, %v36_v53  ;;  %v96_v58 = vld [vmem:[#allocation2 + $0x1c8] sm:$0xff]  ;;  %v2806_v61 = vcombine.low %v88_v48, %v92_v49 }
  0x23   :  { %v100_v59 = vld [vmem:[#allocation2 + $0x1e8] sm:$0xff]  ;;  %v2813_v62 = vcombine.high %v95_v55, %v99_v56  ;;  %v103_v0 = vld [vmem:[#allocation2 + $0x200] sm:$0xff]  ;;  %v2812_v4 = vcombine.low %v95_v55, %v99_v56 }
  0x24   :  { %814 = vmatpush1.bf16.msra.mxu0 %v2780_v34  ;;  %855 = vmatpush1.bf16.msra.mxu1 %v2782_v35  ;;  %v2815_v63 = vcombine.high %v96_v58, %v100_v59  ;;  %v107_v1 = vld [vmem:[#allocation2 + $0x220] sm:$0xff]  ;;  %v104_v2 = vld [vmem:[#allocation2 + $0x208] sm:$0xff]  ;;  %v2814_v5 = vcombine.low %v96_v58, %v100_v59 }
  0x25   :  { %815 = vmatprep.subr.bf16.mxu0 %v2789_v36  ;;  %856 = vmatprep.subr.bf16.mxu1 %v2791_v37  ;;  %v108_v3 = vld [vmem:[#allocation2 + $0x228] sm:$0xff]  ;;  %v2821_v6 = vcombine.high %v103_v0, %v107_v1  ;;  %v111_v8 = vld [vmem:[#allocation2 + $0x240] sm:$0xff]  ;;  %v2820_v12 = vcombine.low %v103_v0, %v107_v1  ;;  %v41_v1 = vld [vmem:[#allocation2 + $0x10] sm:$0xff] }
  0x26   :  { %839 = vmatprep.mubr.bf16.mxu0 %v3204_v57  ;;  %880 = vmatprep.mubr.bf16.mxu1 %v3204_v57  ;;  %v2823_v7 = vcombine.high %v104_v2, %v108_v3  ;;  %v115_v9 = vld [vmem:[#allocation2 + $0x260] sm:$0xff]  ;;  %v112_v10 = vld [vmem:[#allocation2 + $0x248] sm:$0xff]  ;;  %v2822_v13 = vcombine.low %v104_v2, %v108_v3  ;;  %v45_v2 = vld [vmem:[#allocation2 + $0x30] sm:$0xff] }
  0x27   :  { %v116_v11 = vld [vmem:[#allocation2 + $0x268] sm:$0xff]  ;;  %v2829_v14 = vcombine.high %v111_v8, %v115_v9  ;;  %v119_v16 = vld [vmem:[#allocation2 + $0x280] sm:$0xff]  ;;  %v2828_v20 = vcombine.low %v111_v8, %v115_v9  ;;  %v42_v3 = vld [vmem:[#allocation2 + $0x18] sm:$0xff]  ;;  %v2761_v8 = vcombine.high %v41_v1, %v45_v2 }
  0x28   :  { %816 = vmatpush1.bf16.msra.mxu0 %v2788_v42  ;;  %857 = vmatpush1.bf16.msra.mxu1 %v2790_v43  ;;  %v2831_v15 = vcombine.high %v112_v10, %v116_v11  ;;  %v123_v17 = vld [vmem:[#allocation2 + $0x2a0] sm:$0xff]  ;;  %v120_v18 = vld [vmem:[#allocation2 + $0x288] sm:$0xff]  ;;  %v2830_v21 = vcombine.low %v112_v10, %v116_v11  ;;  %v49_v10 = vld [vmem:[#allocation2 + $0x50] sm:$0xff] }
  0x29   :  { %817 = vmatprep.subr.bf16.mxu0 %v2797_v44  ;;  %858 = vmatprep.subr.bf16.mxu1 %v2799_v45  ;;  %v124_v19 = vld [vmem:[#allocation2 + $0x2a8] sm:$0xff]  ;;  %v2837_v22 = vcombine.high %v119_v16, %v123_v17  ;;  %v127_v24 = vld [vmem:[#allocation2 + $0x2c0] sm:$0xff]  ;;  %v2836_v28 = vcombine.low %v119_v16, %v123_v17  ;;  %v53_v11 = vld [vmem:[#allocation2 + $0x70] sm:$0xff] }
  0x2a   :  { %v2839_v23 = vcombine.high %v120_v18, %v124_v19  ;;  %v131_v25 = vld [vmem:[#allocation2 + $0x2e0] sm:$0xff]  ;;  %v128_v26 = vld [vmem:[#allocation2 + $0x2c8] sm:$0xff]  ;;  %v2838_v29 = vcombine.low %v120_v18, %v124_v19  ;;  %v2769_v17 = vcombine.high %v49_v10, %v53_v11  ;;  %v57_v19 = vld [vmem:[#allocation2 + $0x90] sm:$0xff] }
  0x2b   :  { %v132_v27 = vld [vmem:[#allocation2 + $0x2e8] sm:$0xff]  ;;  %v2845_v30 = vcombine.high %v127_v24, %v131_v25  ;;  %v135_v32 = vld [vmem:[#allocation2 + $0x300] sm:$0xff]  ;;  %v2844_v36 = vcombine.low %v127_v24, %v131_v25 }
  0x2c   :  { %818 = vmatpush1.bf16.msra.mxu0 %v2796_v50  ;;  %859 = vmatpush1.bf16.msra.mxu1 %v2798_v51  ;;  %v2847_v31 = vcombine.high %v128_v26, %v132_v27  ;;  %v139_v33 = vld [vmem:[#allocation2 + $0x320] sm:$0xff]  ;;  %v136_v34 = vld [vmem:[#allocation2 + $0x308] sm:$0xff]  ;;  %v2846_v37 = vcombine.low %v128_v26, %v132_v27  ;;  %v65_v27 = vld [vmem:[#allocation2 + $0xd0] sm:$0xff] }
  0x2d   :  { %819 = vmatprep.subr.bf16.mxu0 %v2805_v52  ;;  %860 = vmatprep.subr.bf16.mxu1 %v2807_v54  ;;  %v140_v35 = vld [vmem:[#allocation2 + $0x328] sm:$0xff]  ;;  %v2853_v38 = vcombine.high %v135_v32, %v139_v33  ;;  %v143_v40 = vld [vmem:[#allocation2 + $0x340] sm:$0xff]  ;;  %v2852_v44 = vcombine.low %v135_v32, %v139_v33 }
  0x2e   :  { %v2855_v39 = vcombine.high %v136_v34, %v140_v35  ;;  %v147_v41 = vld [vmem:[#allocation2 + $0x360] sm:$0xff]  ;;  %v144_v42 = vld [vmem:[#allocation2 + $0x348] sm:$0xff]  ;;  %v2854_v45 = vcombine.low %v136_v34, %v140_v35  ;;  %v73_v35 = vld [vmem:[#allocation2 + $0x110] sm:$0xff] }
  0x2f   :  { %v148_v43 = vld [vmem:[#allocation2 + $0x368] sm:$0xff]  ;;  %v2861_v46 = vcombine.high %v143_v40, %v147_v41  ;;  %v151_v48 = vld [vmem:[#allocation2 + $0x380] sm:$0xff]  ;;  %v2860_v52 = vcombine.low %v143_v40, %v147_v41 }
  0x30   :  { %820 = vmatpush1.bf16.msra.mxu0 %v2804_v60  ;;  %861 = vmatpush1.bf16.msra.mxu1 %v2806_v61  ;;  %v2863_v47 = vcombine.high %v144_v42, %v148_v43  ;;  %v155_v49 = vld [vmem:[#allocation2 + $0x3a0] sm:$0xff]  ;;  %v152_v50 = vld [vmem:[#allocation2 + $0x388] sm:$0xff]  ;;  %v2862_v53 = vcombine.low %v144_v42, %v148_v43  ;;  %v81_v42 = vld [vmem:[#allocation2 + $0x150] sm:$0xff] }
  0x31   :  { %821 = vmatprep.subr.bf16.mxu0 %v2813_v62  ;;  %862 = vmatprep.subr.bf16.mxu1 %v2815_v63  ;;  %v156_v51 = vld [vmem:[#allocation2 + $0x3a8] sm:$0xff]  ;;  %v2869_v54 = vcombine.high %v151_v48, %v155_v49  ;;  %v159_v56 = vld [vmem:[#allocation2 + $0x3c0] sm:$0xff]  ;;  %v2868_v61 = vcombine.low %v151_v48, %v155_v49  ;;  %v85_v43 = vld [vmem:[#allocation2 + $0x170] sm:$0xff] }
  0x32   :  { %v2871_v55 = vcombine.high %v152_v50, %v156_v51  ;;  %v163_v58 = vld [vmem:[#allocation2 + $0x3e0] sm:$0xff]  ;;  %v160_v59 = vld [vmem:[#allocation2 + $0x3c8] sm:$0xff]  ;;  %v2870_v62 = vcombine.low %v152_v50, %v156_v51  ;;  %v2801_v48 = vcombine.high %v81_v42, %v85_v43  ;;  %v89_v50 = vld [vmem:[#allocation2 + $0x190] sm:$0xff] }
  0x33   :  { %v164_v60 = vld [vmem:[#allocation2 + $0x3e8] sm:$0xff]  ;;  %v2877_v63 = vcombine.high %v159_v56, %v163_v58  ;;  %v93_v51 = vld [vmem:[#allocation2 + $0x1b0] sm:$0xff] }
  0x34   :  { %822 = vmatpush1.bf16.msra.mxu0 %v2812_v4  ;;  %863 = vmatpush1.bf16.msra.mxu1 %v2814_v5  ;;  %v2879_v0 = vcombine.high %v160_v59, %v164_v60  ;;  %v46_v4 = vld [vmem:[#allocation2 + $0x38] sm:$0xff]  ;;  %v2876_v5 = vcombine.low %v159_v56, %v163_v58  ;;  %v2809_v56 = vcombine.high %v89_v50, %v93_v51 }
  0x35   :  { %823 = vmatprep.subr.bf16.mxu0 %v2821_v6  ;;  %864 = vmatprep.subr.bf16.mxu1 %v2823_v7  ;;  %v35_v6 = vld [vmem:[%s3666_s0] sm:$0xff]  ;;  %v2878_v7 = vcombine.low %v160_v59, %v164_v60  ;;  %v2763_v9 = vcombine.high %v42_v3, %v46_v4  ;;  %v2762_v16 = vcombine.low %v42_v3, %v46_v4  ;;  %v97_v59 = vld [vmem:[#allocation2 + $0x1d0] sm:$0xff] }
  0x36   :  { %v101_v60 = vld [vmem:[#allocation2 + $0x1f0] sm:$0xff] }
  0x37   :  { %v105_v3 = vld [vmem:[#allocation2 + $0x210] sm:$0xff] }
  0x38   :  { %824 = vmatpush1.bf16.msra.mxu0 %v2820_v12  ;;  %865 = vmatpush1.bf16.msra.mxu1 %v2822_v13  ;;  %v3211_v12 = vpack.c.bf16 %v35_v6, %v35_v6  ;;  %v50_v13 = vld [vmem:[#allocation2 + $0x58] sm:$0xff]  ;;  %v109_v4 = vld [vmem:[#allocation2 + $0x230] sm:$0xff] }
  0x39   :  { %825 = vmatprep.subr.bf16.mxu0 %v2829_v14  ;;  %866 = vmatprep.subr.bf16.mxu1 %v2831_v15  ;;  %v54_v14 = vld [vmem:[#allocation2 + $0x78] sm:$0xff]  ;;  %v2760_v15 = vcombine.low %v41_v1, %v45_v2  ;;  %v2817_v1 = vcombine.high %v97_v59, %v101_v60 }
  0x3a   :  { %v2771_v18 = vcombine.high %v50_v13, %v54_v14  ;;  %v2770_v24 = vcombine.low %v50_v13, %v54_v14  ;;  %v110_v6 = vld [vmem:[#allocation2 + $0x238] sm:$0xff]  ;;  %v117_v13 = vld [vmem:[#allocation2 + $0x270] sm:$0xff] }
  0x3b   :  { %v114_v14 = vld [vmem:[#allocation2 + $0x258] sm:$0xff] }
  0x3c   :  { %826 = vmatpush1.bf16.msra.mxu0 %v2828_v20  ;;  %867 = vmatpush1.bf16.msra.mxu1 %v2830_v21  ;;  %v61_v20 = vld [vmem:[#allocation2 + $0xb0] sm:$0xff]  ;;  %v58_v21 = vld [vmem:[#allocation2 + $0x98] sm:$0xff] }
  0x3d   :  { %827 = vmatprep.subr.bf16.mxu0 %v2837_v22  ;;  %868 = vmatprep.subr.bf16.mxu1 %v2839_v23  ;;  %v62_v22 = vld [vmem:[#allocation2 + $0xb8] sm:$0xff]  ;;  %v2768_v23 = vcombine.low %v49_v10, %v53_v11  ;;  %v2777_v25 = vcombine.high %v57_v19, %v61_v20  ;;  %v113_v11 = vld [vmem:[#allocation2 + $0x250] sm:$0xff] }
  0x3e   :  { %v2779_v26 = vcombine.high %v58_v21, %v62_v22  ;;  %v2778_v32 = vcombine.low %v58_v21, %v62_v22  ;;  %v125_v21 = vld [vmem:[#allocation2 + $0x2b0] sm:$0xff]  ;;  %v122_v22 = vld [vmem:[#allocation2 + $0x298] sm:$0xff] }
  0x40   :  { %828 = vmatpush1.bf16.msra.mxu0 %v2836_v28  ;;  %869 = vmatpush1.bf16.msra.mxu1 %v2838_v29  ;;  %v69_v28 = vld [vmem:[#allocation2 + $0xf0] sm:$0xff]  ;;  %v66_v29 = vld [vmem:[#allocation2 + $0xd8] sm:$0xff] }
  0x41   :  { %829 = vmatprep.subr.bf16.mxu0 %v2845_v30  ;;  %870 = vmatprep.subr.bf16.mxu1 %v2847_v31  ;;  %v70_v30 = vld [vmem:[#allocation2 + $0xf8] sm:$0xff]  ;;  %v2776_v31 = vcombine.low %v57_v19, %v61_v20  ;;  %v2785_v33 = vcombine.high %v65_v27, %v69_v28  ;;  %v121_v20 = vld [vmem:[#allocation2 + $0x290] sm:$0xff] }
  0x42   :  { %v2787_v34 = vcombine.high %v66_v29, %v70_v30  ;;  %v2786_v40 = vcombine.low %v66_v29, %v70_v30  ;;  %v133_v29 = vld [vmem:[#allocation2 + $0x2f0] sm:$0xff]  ;;  %v130_v30 = vld [vmem:[#allocation2 + $0x2d8] sm:$0xff] }
  0x44   :  { %830 = vmatpush1.bf16.msra.mxu0 %v2844_v36  ;;  %871 = vmatpush1.bf16.msra.mxu1 %v2846_v37  ;;  %v77_v36 = vld [vmem:[#allocation2 + $0x130] sm:$0xff]  ;;  %v74_v37 = vld [vmem:[#allocation2 + $0x118] sm:$0xff] }
  0x45   :  { %831 = vmatprep.subr.bf16.mxu0 %v2853_v38  ;;  %872 = vmatprep.subr.bf16.mxu1 %v2855_v39  ;;  %v78_v38 = vld [vmem:[#allocation2 + $0x138] sm:$0xff]  ;;  %v2784_v39 = vcombine.low %v65_v27, %v69_v28  ;;  %v2793_v41 = vcombine.high %v73_v35, %v77_v36  ;;  %v129_v28 = vld [vmem:[#allocation2 + $0x2d0] sm:$0xff] }
  0x48   :  { %832 = vmatpush1.bf16.msra.mxu0 %v2852_v44  ;;  %873 = vmatpush1.bf16.msra.mxu1 %v2854_v45  ;;  %v82_v44 = vld [vmem:[#allocation2 + $0x158] sm:$0xff] }
  0x49   :  { %833 = vmatprep.subr.bf16.mxu0 %v2861_v46  ;;  %874 = vmatprep.subr.bf16.mxu1 %v2863_v47  ;;  %v86_v45 = vld [vmem:[#allocation2 + $0x178] sm:$0xff]  ;;  %v2792_v46 = vcombine.low %v73_v35, %v77_v36  ;;  %v2794_v47 = vcombine.low %v74_v37, %v78_v38  ;;  %v137_v36 = vld [vmem:[#allocation2 + $0x310] sm:$0xff] }
  0x4a   :  { %v2803_v49 = vcombine.high %v82_v44, %v86_v45 }
  0x4c   :  { %834 = vmatpush1.bf16.msra.mxu0 %v2860_v52  ;;  %875 = vmatpush1.bf16.msra.mxu1 %v2862_v53  ;;  %v90_v52 = vld [vmem:[#allocation2 + $0x198] sm:$0xff] }
  0x4d   :  { %835 = vmatprep.subr.bf16.mxu0 %v2869_v54  ;;  %876 = vmatprep.subr.bf16.mxu1 %v2871_v55  ;;  %v94_v53 = vld [vmem:[#allocation2 + $0x1b8] sm:$0xff]  ;;  %v2800_v54 = vcombine.low %v81_v42, %v85_v43  ;;  %v2802_v55 = vcombine.low %v82_v44, %v86_v45  ;;  %v145_v43 = vld [vmem:[#allocation2 + $0x350] sm:$0xff] }
  0x4e   :  { %v2811_v58 = vcombine.high %v90_v52, %v94_v53  ;;  %v149_v44 = vld [vmem:[#allocation2 + $0x370] sm:$0xff]  ;;  %v146_v45 = vld [vmem:[#allocation2 + $0x358] sm:$0xff] }
  0x50   :  { %836 = vmatpush1.bf16.msra.mxu0 %v2868_v61  ;;  %877 = vmatpush1.bf16.msra.mxu1 %v2870_v62  ;;  %v98_v61 = vld [vmem:[#allocation2 + $0x1d8] sm:$0xff] }
  0x51   :  { %837 = vmatprep.subr.bf16.mxu0 %v2877_v63  ;;  %878 = vmatprep.subr.bf16.mxu1 %v2879_v0  ;;  %v102_v62 = vld [vmem:[#allocation2 + $0x1f8] sm:$0xff]  ;;  %v2808_v63 = vcombine.low %v89_v50, %v93_v51  ;;  %v2810_v0 = vcombine.low %v90_v52, %v94_v53  ;;  %v153_v51 = vld [vmem:[#allocation2 + $0x390] sm:$0xff] }
  0x52   :  { %v2819_v2 = vcombine.high %v98_v61, %v102_v62  ;;  %v157_v52 = vld [vmem:[#allocation2 + $0x3b0] sm:$0xff]  ;;  %v154_v53 = vld [vmem:[#allocation2 + $0x398] sm:$0xff] }
  0x54   :  { %838 = vmatpush1.bf16.msra.mxu0 %v2876_v5  ;;  %879 = vmatpush1.bf16.msra.mxu1 %v2878_v7  ;;  %v106_v5 = vld [vmem:[#allocation2 + $0x218] sm:$0xff]  ;;  %v2816_v7 = vcombine.low %v97_v59, %v101_v60  ;;  %v161_v60 = vld [vmem:[#allocation2 + $0x3d0] sm:$0xff] }
  0x55   :  { %889 = vmatprep.subr.bf16.mxu0 %v2761_v8  ;;  %930 = vmatprep.subr.bf16.mxu1 %v2763_v9  ;;  %v2818_v8 = vcombine.low %v98_v61, %v102_v62  ;;  %v2825_v9 = vcombine.high %v105_v3, %v109_v4  ;;  %v2827_v10 = vcombine.high %v106_v5, %v110_v6  ;;  %v165_v61 = vld [vmem:[#allocation2 + $0x3f0] sm:$0xff]  ;;  %v162_v62 = vld [vmem:[#allocation2 + $0x3d8] sm:$0xff] }
  0x57   :  { %840 = vmatmul.mubr.bf16.vlgmr.msra.gmra.mrb[0].mxu0 %v3211_v12  ;;  %881 = vmatmul.mubr.bf16.vlgmr.msra.gmra.mrb[0].mxu1 %v3211_v12 }
  0x58   :  { %890 = vmatpush1.bf16.msra.mxu0 %v2760_v15  ;;  %931 = vmatpush1.bf16.msra.mxu1 %v2762_v16  ;;  %v118_v15 = vld [vmem:[#allocation2 + $0x278] sm:$0xff]  ;;  %v2824_v16 = vcombine.low %v105_v3, %v109_v4  ;;  %v2880_v4 = vcombine.low %v161_v60, %v165_v61 }
  0x59   :  { %891 = vmatprep.subr.bf16.mxu0 %v2769_v17  ;;  %932 = vmatprep.subr.bf16.mxu1 %v2771_v18  ;;  %v2826_v17 = vcombine.low %v106_v5, %v110_v6  ;;  %v2833_v18 = vcombine.high %v113_v11, %v117_v13  ;;  %v2835_v19 = vcombine.high %v114_v14, %v118_v15  ;;  %v3151_v6 = vmov 0.0  }
  0x5a   :  { %921 = vmatprep.mubr.bf16.mxu0 %v3204_v57  ;;  %962 = vmatprep.mubr.bf16.mxu1 %v3204_v57  ;;  %v2795_v57 = vcombine.high %v74_v37, %v78_v38  ;;  %v141_v37 = vld [vmem:[#allocation2 + $0x330] sm:$0xff]  ;;  %v138_v38 = vld [vmem:[#allocation2 + $0x318] sm:$0xff] }
  0x5c   :  { %892 = vmatpush1.bf16.msra.mxu0 %v2768_v23  ;;  %933 = vmatpush1.bf16.msra.mxu1 %v2770_v24  ;;  %v126_v23 = vld [vmem:[#allocation2 + $0x2b8] sm:$0xff]  ;;  %v2832_v24 = vcombine.low %v113_v11, %v117_v13 }
  0x5d   :  { %893 = vmatprep.subr.bf16.mxu0 %v2777_v25  ;;  %934 = vmatprep.subr.bf16.mxu1 %v2779_v26  ;;  %v2834_v25 = vcombine.low %v114_v14, %v118_v15  ;;  %v2841_v26 = vcombine.high %v121_v20, %v125_v21  ;;  %v2843_v27 = vcombine.high %v122_v22, %v126_v23 }
  0x60   :  { %894 = vmatpush1.bf16.msra.mxu0 %v2776_v31  ;;  %935 = vmatpush1.bf16.msra.mxu1 %v2778_v32  ;;  %v134_v31 = vld [vmem:[#allocation2 + $0x2f8] sm:$0xff]  ;;  %v2840_v32 = vcombine.low %v121_v20, %v125_v21 }
  0x61   :  { %895 = vmatprep.subr.bf16.mxu0 %v2785_v33  ;;  %936 = vmatprep.subr.bf16.mxu1 %v2787_v34  ;;  %v2842_v33 = vcombine.low %v122_v22, %v126_v23  ;;  %v2849_v34 = vcombine.high %v129_v28, %v133_v29  ;;  %v2851_v35 = vcombine.high %v130_v30, %v134_v31 }
  0x64   :  { %896 = vmatpush1.bf16.msra.mxu0 %v2784_v39  ;;  %937 = vmatpush1.bf16.msra.mxu1 %v2786_v40  ;;  %v142_v39 = vld [vmem:[#allocation2 + $0x338] sm:$0xff]  ;;  %v2848_v40 = vcombine.low %v129_v28, %v133_v29 }
  0x65   :  { %897 = vmatprep.subr.bf16.mxu0 %v2793_v41  ;;  %938 = vmatprep.subr.bf16.mxu1 %v2795_v57  ;;  %v2850_v41 = vcombine.low %v130_v30, %v134_v31  ;;  %v2857_v57 = vcombine.high %v137_v36, %v141_v37  ;;  %v2859_v42 = vcombine.high %v138_v38, %v142_v39 }
  0x68   :  { %898 = vmatpush1.bf16.msra.mxu0 %v2792_v46  ;;  %939 = vmatpush1.bf16.msra.mxu1 %v2794_v47  ;;  %v150_v46 = vld [vmem:[#allocation2 + $0x378] sm:$0xff]  ;;  %v2856_v47 = vcombine.low %v137_v36, %v141_v37 }
  0x69   :  { %899 = vmatprep.subr.bf16.mxu0 %v2801_v48  ;;  %940 = vmatprep.subr.bf16.mxu1 %v2803_v49  ;;  %v2858_v48 = vcombine.low %v138_v38, %v142_v39  ;;  %v2865_v49 = vcombine.high %v145_v43, %v149_v44  ;;  %v2867_v50 = vcombine.high %v146_v45, %v150_v46 }
  0x6c   :  { %900 = vmatpush1.bf16.msra.mxu0 %v2800_v54  ;;  %941 = vmatpush1.bf16.msra.mxu1 %v2802_v55  ;;  %v158_v54 = vld [vmem:[#allocation2 + $0x3b8] sm:$0xff]  ;;  %v2864_v55 = vcombine.low %v145_v43, %v149_v44  ;;  %v3153_v44 = vmov 0  }
  0x6d   :  { %901 = vmatprep.subr.bf16.mxu0 %v2809_v56  ;;  %942 = vmatprep.subr.bf16.mxu1 %v2811_v58  ;;  %v2866_v56 = vcombine.low %v146_v45, %v150_v46  ;;  %v2873_v58 = vcombine.high %v153_v51, %v157_v52  ;;  %v2875_v59 = vcombine.high %v154_v53, %v158_v54  ;;  %v980_v45 = vlaneseq }
  0x6e   :  { %3034 = vset.pattern.permute.xlu1 %v3153_v44 }
  0x6f   :  { %v3264_v46 = vshrl.u32 %v980_v45, 7 }
  0x70   :  { %902 = vmatpush1.bf16.msra.mxu0 %v2808_v63  ;;  %943 = vmatpush1.bf16.msra.mxu1 %v2810_v0  ;;  %v166_v63 = vld [vmem:[#allocation2 + $0x3f8] sm:$0xff]  ;;  %v2872_v0 = vcombine.low %v153_v51, %v157_v52 }
  0x71   :  { %903 = vmatprep.subr.bf16.mxu0 %v2817_v1  ;;  %944 = vmatprep.subr.bf16.mxu1 %v2819_v2  ;;  %v2874_v1 = vcombine.low %v154_v53, %v158_v54  ;;  %v2881_v2 = vcombine.high %v161_v60, %v165_v61  ;;  %v2883_v3 = vcombine.high %v162_v62, %v166_v63  ;;  %v3278_v53 = vld [vmem:[%s3669_s3] sm:$0xff]  ;;  %v3154_v54 = vmov 1  }
  0x72   :  { %v2882_v5 = vcombine.low %v162_v62, %v166_v63  ;;  %3035 = vset.pattern.permute.xlu0 %v3154_v54 }
  0x74   :  { %904 = vmatpush1.bf16.msra.mxu0 %v2816_v7  ;;  %945 = vmatpush1.bf16.msra.mxu1 %v2818_v8 }
  0x75   :  { %905 = vmatprep.subr.bf16.mxu0 %v2825_v9  ;;  %946 = vmatprep.subr.bf16.mxu1 %v2827_v10 }
  0x78   :  { %906 = vmatpush1.bf16.msra.mxu0 %v2824_v16  ;;  %947 = vmatpush1.bf16.msra.mxu1 %v2826_v17 }
  0x79   :  { %907 = vmatprep.subr.bf16.mxu0 %v2833_v18  ;;  %948 = vmatprep.subr.bf16.mxu1 %v2835_v19 }
  0x7c   :  { %908 = vmatpush1.bf16.msra.mxu0 %v2832_v24  ;;  %949 = vmatpush1.bf16.msra.mxu1 %v2834_v25 }
  0x7d   :  { %909 = vmatprep.subr.bf16.mxu0 %v2841_v26  ;;  %950 = vmatprep.subr.bf16.mxu1 %v2843_v27 }
  0x80   :  { %910 = vmatpush1.bf16.msra.mxu0 %v2840_v32  ;;  %951 = vmatpush1.bf16.msra.mxu1 %v2842_v33 }
  0x81   :  { %911 = vmatprep.subr.bf16.mxu0 %v2849_v34  ;;  %952 = vmatprep.subr.bf16.mxu1 %v2851_v35 }
  0x84   :  { %912 = vmatpush1.bf16.msra.mxu0 %v2848_v40  ;;  %953 = vmatpush1.bf16.msra.mxu1 %v2850_v41 }
  0x85   :  { %913 = vmatprep.subr.bf16.mxu0 %v2857_v57  ;;  %954 = vmatprep.subr.bf16.mxu1 %v2859_v42 }
  0x88   :  { %914 = vmatpush1.bf16.msra.mxu0 %v2856_v47  ;;  %955 = vmatpush1.bf16.msra.mxu1 %v2858_v48  ;;  %v3266_v47 = vand.u32 127, %v980_v45  ;;  %v988_v48 = vand.u32 3, %v3264_v46 }
  0x89   :  { %915 = vmatprep.subr.bf16.mxu0 %v2865_v49  ;;  %956 = vmatprep.subr.bf16.mxu1 %v2867_v50 }
  0x8a   :  { %v1000_v49 = vand.u32 3, %v3266_v47  ;;  %vm1368_vm3 = vcmp.lt.s32.totalorder %v3266_v47, 127  ;;  %vm1836_vm13 = vcmp.lt.s32.totalorder %v3266_v47, 96  ;;  %vm2115_vm15 = vcmp.lt.s32.totalorder %v3266_v47, 95 }
  0x8c   :  { %916 = vmatpush1.bf16.msra.mxu0 %v2864_v55  ;;  %957 = vmatpush1.bf16.msra.mxu1 %v2866_v56  ;;  %vm1008_vm1 = vcmp.eq.s32.totalorder %v988_v48, %v1000_v49 }
  0x8d   :  { %917 = vmatprep.subr.bf16.mxu0 %v2873_v58  ;;  %958 = vmatprep.subr.bf16.mxu1 %v2875_v59  ;;  %v1009_v50 = vsel %vm1008_vm1, 0.00048828125, %v3151_v6  ;;  %vm2437_vm1 = vcmask 130048  }
  0x90   :  { %918 = vmatpush1.bf16.msra.mxu0 %v2872_v0  ;;  %959 = vmatpush1.bf16.msra.mxu1 %v2874_v1 }
  0x91   :  { %919 = vmatprep.subr.bf16.mxu0 %v2881_v2  ;;  %960 = vmatprep.subr.bf16.mxu1 %v2883_v3 }
  0x94   :  { %920 = vmatpush1.bf16.msra.mxu0 %v2880_v4  ;;  %961 = vmatpush1.bf16.msra.mxu1 %v2882_v5 }
  0x95   :  { %2938 = vmatprep.subr.mxu0 %v3151_v6  ;;  %2943 = vmatprep.subr.mxu1 %v3151_v6 }
  0x97   :  { %922 = vmatmul.mubr.bf16.vlgmr.msra.gmra.mrb[4].mxu0 %v3211_v12  ;;  %963 = vmatmul.mubr.bf16.vlgmr.msra.gmra.mrb[4].mxu1 %v3211_v12 }
  0x98   :  { %2940 = vmatprep.mubr.msk.f32.mxu0 %vm3152_vm0, %v3151_v6  ;;  %2945 = vmatprep.mubr.msk.f32.mxu1 %vm3152_vm0, %v3151_v6 }
 0x12a   :  { %v3221_v7 = vpop.f32.mrb[0].mxu0  ;;  %v3227_v10 = vpop.f32.mrb[0].mxu1 }
 0x12b   :  { %v1084_v8 = vmul.f32 %v3221_v7, %v3221_v7  ;;  %v3225_v9 = vpop.f32.mrb[1].mxu0  ;;  %v1086_v14 = vmul.f32 %v3227_v10, %v3227_v10  ;;  %v3235_v15 = vpop.f32.mrb[1].mxu1 }
 0x12c   :  { %v971_v11 = vadd.f32 %v3225_v9, %v3221_v7  ;;  %v1085_v12 = vmul.f32 %v3225_v9, %v3225_v9  ;;  %v845_v13 = vpop.f32.mrb[2].mxu0  ;;  %v886_v17 = vpop.f32.mrb[2].mxu1  ;;  %v1087_v20 = vmul.f32 %v3235_v15, %v3235_v15 }
 0x12d   :  { %v846_v16 = vpop.f32.mrb[3].mxu0  ;;  %v887_v21 = vpop.f32.mrb[3].mxu1 }
 0x12e   :  { %v1092_v18 = vadd.f32 %v1085_v12, %v1084_v8  ;;  %v972_v19 = vadd.f32 %v971_v11, %v3227_v10 }
 0x130   :  { %v1093_v22 = vadd.f32 %v1092_v18, %v1086_v14  ;;  %v973_v23 = vadd.f32 %v972_v19, %v3235_v15 }
 0x132   :  { %v1094_v24 = vadd.f32 %v1093_v22, %v1087_v20 }
 0x16a   :  { %v3241_v25 = vpop.f32.mrb[4].mxu0  ;;  %v3248_v29 = vpop.f32.mrb[4].mxu1 }
 0x16b   :  { %v974_v26 = vadd.f32 %v973_v23, %v3241_v25  ;;  %v1088_v27 = vmul.f32 %v3241_v25, %v3241_v25  ;;  %v3246_v28 = vpop.f32.mrb[5].mxu0  ;;  %v3252_v32 = vpop.f32.mrb[5].mxu1  ;;  %v1090_v35 = vmul.f32 %v3248_v29, %v3248_v29 }
 0x16c   :  { %v1089_v30 = vmul.f32 %v3246_v28, %v3246_v28  ;;  %v927_v31 = vpop.f32.mrb[6].mxu0  ;;  %v968_v37 = vpop.f32.mrb[6].mxu1  ;;  %v1091_v57 = vmul.f32 %v3252_v32, %v3252_v32 }
 0x16d   :  { %v1095_v33 = vadd.f32 %v1094_v24, %v1088_v27  ;;  %v975_v34 = vadd.f32 %v974_v26, %v3246_v28  ;;  %v928_v36 = vpop.f32.mrb[7].mxu0  ;;  %v969_v38 = vpop.f32.mrb[7].mxu1 }
 0x16e   :  { %v1234_v36 = vand.u32 31, %v3266_v47 }
 0x16f   :  { %v976_v39 = vadd.f32 %v975_v34, %v3248_v29  ;;  %v1096_v40 = vadd.f32 %v1095_v33, %v1089_v30 }
 0x170   :  { %vm3326_vm4 = vcmp.lt.s32.totalorder %v1234_v36, 31 }
 0x171   :  { %v977_v41 = vadd.f32 %v976_v39, %v3252_v32  ;;  %v1097_v42 = vadd.f32 %v1096_v40, %v1090_v35  ;;  %v1215_v35 = vadd.s32 128, %v3266_v47 }
 0x173   :  { %978 = vadd.xlane.f32.xlu0 %v977_v41  ;;  %v1098_v43 = vadd.f32 %v1097_v42, %v1091_v57  ;;  %v1241_v37 = vand.u32 31, %v1215_v35  ;;  %v1216_v57 = vadd.s32 256, %v3266_v47  ;;  %v1217_v42 = vadd.s32 384, %v3266_v47 }
 0x175   :  { %vm3334_vm5 = vcmp.lt.s32.totalorder %v1241_v37, 31 }
 0x177   :  { %1099 = vadd.xlane.f32.xlu0 %v1098_v43 }
 0x18d   :  { %1204 = vperm.xlu0 %3035, %v3278_v53  }
 0x191   :  { %3086 = vset.pattern.permute.xlu0 %v3153_v44 }
 0x200   :  { %v979_v51 = vpop.xlane.xlu0 %978 }
 0x201   :  { %2939 = vmatpush3.msra.mxu0 %v979_v51  ;;  %v1218_v51 = vadd.s32 512, %v3266_v47 }
 0x202   :  { %2941 = vmatmul.mubr.msk.f32.vlgmr.msra.gmra.mrb[8].mxu0 %vm1010_vm2, %v1009_v50 }
 0x203   :  { %1476 = vmatprep.mubr.bf16.mxu0 %v3153_v44 }
 0x204   :  { %v1100_v52 = vpop.xlane.xlu0 %1099 }
 0x205   :  { %2944 = vmatpush3.msra.mxu1 %v1100_v52 }
 0x206   :  { %2946 = vmatmul.mubr.msk.f32.vlgmr.msra.gmra.mrb[8].mxu1 %vm1010_vm2, %v1009_v50  ;;  %v1219_v50 = vadd.s32 640, %v3266_v47 }
 0x207   :  { %1519 = vmatprep.mubr.bf16.mxu1 %v3153_v44 }
 0x20c   :  { %v1205_v11 = vpop.permute.xlu0 %1204 }
 0x2d5   :  { %v1080_v55 = vpop.f32.mrb[8].mxu0 }
 0x2d6   :  { %v1171_v56 = vmul.f32 %v1080_v55, %v1080_v55  ;;  %1178 = vperm.xlu1 %3034, %v1080_v55   ;;  %v2942_v58 = vpop.f32.mrb[9].mxu0  ;;  %v1248_v55 = vand.u32 31, %v1216_v57 }
 0x2d7   :  { %v1220_v58 = vadd.s32 768, %v3266_v47 }
 0x2d8   :  { %vm3355_vm7 = vcmp.lt.s32.totalorder %v1248_v55, 31 }
 0x2d9   :  { %v1167_v59 = vpop.f32.mrb[8].mxu1 }
 0x2da   :  { %v1172_v60 = vsub.f32 %v1167_v59, %v1171_v56  ;;  %v2947_v61 = vpop.f32.mrb[9].mxu1  ;;  %v1255_v59 = vand.u32 31, %v1217_v42 }
 0x2db   :  { %v3348_v61 = vadd.s32 896, %v3266_v47 }
 0x2dc   :  { %v1173_v62 = vadd.f32 1e-05, %v1172_v60  ;;  %vm3359_vm8 = vcmp.lt.s32.totalorder %v1255_v59, 31 }
 0x2dd   :  { %vm1229_vm14 = vcmp.lt.s32.totalorder %v3348_v61, 992 }
 0x2de   :  { %3094 = vrsqrt.f32 %v1173_v62 }
 0x2e8   :  { %v3095_v63 = vpop.eup %3094 }
 0x2e9   :  { %v1175_v0 = vmul.f32 %v3095_v63, %v3278_v53  ;;  %v1269_v63 = vand.u32 31, %v1219_v50 }
 0x2eb   :  { %1191 = vperm.xlu1 %3034, %v1175_v0   ;;  %v1262_v0 = vand.u32 31, %v1218_v51  ;;  %vm3370_vm9 = vcmp.lt.s32.totalorder %v1269_v63, 31 }
 0x2ed   :  { %vm3376_vm10 = vcmp.lt.s32.totalorder %v1262_v0, 31 }
 0x355   :  { %v1179_v1 = vpop.permute.xlu1 %1178 }
 0x356   :  { %v1184_v2 = vsub.f32 %v3235_v15, %v1179_v1  ;;  %v1185_v3 = vsub.f32 %v3241_v25, %v1179_v1  ;;  %v1181_v4 = vsub.f32 %v3221_v7, %v1179_v1  ;;  %v1182_v5 = vsub.f32 %v3225_v9, %v1179_v1 }
 0x357   :  { %v1188_v12 = vsub.f32 %v3252_v32, %v1179_v1  ;;  %v1183_v13 = vsub.f32 %v3227_v10, %v1179_v1  ;;  %v1186_v14 = vsub.f32 %v3246_v28, %v1179_v1  ;;  %v1187_v16 = vsub.f32 %v3248_v29, %v1179_v1 }
 0x36a   :  { %v1192_v8 = vpop.permute.xlu1 %1191 }
 0x36b   :  { %v1197_v17 = vmul.f32 %v1192_v8, %v1184_v2  ;;  %v1198_v18 = vmul.f32 %v1192_v8, %v1185_v3  ;;  %v1194_v19 = vmul.f32 %v1192_v8, %v1181_v4  ;;  %v1195_v15 = vmul.f32 %v1192_v8, %v1182_v5  ;;  %v3090_v4 = vld [vmem:[%s3668_s2 + $0x8] sm:$0xff]  }
 0x36c   :  { %v1201_v20 = vmul.f32 %v1192_v8, %v1188_v12  ;;  %v1196_v21 = vmul.f32 %v1192_v8, %v1183_v13  ;;  %v1199_v22 = vmul.f32 %v1192_v8, %v1186_v14  ;;  %v1200_v7 = vmul.f32 %v1192_v8, %v1187_v16 }
 0x36d   :  { %v3291_v23 = vadd.f32 %v1205_v11, %v1197_v17  ;;  %v3293_v9 = vadd.f32 %v1205_v11, %v1198_v18  ;;  %v3295_v24 = vadd.f32 %v1205_v11, %v1194_v19  ;;  %v3297_v25 = vadd.f32 %v1205_v11, %v1195_v15 }
 0x36e   :  { %v3299_v10 = vadd.f32 %v1205_v11, %v1201_v20  ;;  %v3301_v26 = vadd.f32 %v1205_v11, %v1196_v21  ;;  %v3303_v27 = vadd.f32 %v1205_v11, %v1199_v22  ;;  %v3305_v28 = vadd.f32 %v1205_v11, %v1200_v7 }
 0x36f   :  { %v3076_v29 = vpack.i.bf16 %v3293_v9, %v3291_v23  ;;  %v3036_v30 = vpack.i.bf16 %v3297_v25, %v3295_v24  ;;  %v1276_v8 = vand.u32 31, %v1220_v58  ;;  %v1283_v14 = vand.u32 31, %v3348_v61 }
 0x370   :  { %v3046_v31 = vpack.i.bf16 %v3305_v28, %v3303_v27  ;;  %v3056_v32 = vpack.i.bf16 %v3291_v23, %v3301_v26  ;;  %v3061_v33 = vpack.i.bf16 %v3303_v27, %v3293_v9  ;;  %v3066_v34 = vpack.i.bf16 %v3299_v10, %v3305_v28 }
 0x371   :  { %3077 = vrot.lane.b32.xlu0 %v3076_v29, %s3155_s7  ;;  %3037 = vrot.lane.b32.xlu1 %v3036_v30, %s3156_s8  ;;  %vm3381_vm11 = vcmp.lt.s32.totalorder %v1276_v8, 31  ;;  %vm3391_vm12 = vcmp.lt.s32.totalorder %v1283_v14, 31  ;;  %v1349_v55 = vpack.c.bf16 %v3303_v27, %v3303_v27  ;;  %v1351_v27 = vpack.c.bf16 %v3299_v10, %v3299_v10 }
 0x372   :  { %vm1341_vm0 = vmand %vm1229_vm14, %vm3391_vm12 }
 0x375   :  { %2113 = vrot.lane.b32.xlu0 %v3299_v10, %s3155_s7  ;;  %1356 = vrot.lane.b32.xlu1 %v3301_v26, %s3156_s8 }
 0x379   :  { %3042 = vrot.lane.b32.xlu1 %v3076_v29, %s3156_s8 }
 0x37d   :  { %3047 = vrot.lane.b32.xlu1 %v3046_v31, %s3156_s8 }
 0x381   :  { %1366 = vrot.lane.b32.xlu1 %v3299_v10, %s3156_s8 }
 0x385   :  { %3052 = vrot.lane.b32.xlu1 %v3036_v30, %s3157_s9 }
 0x389   :  { %3057 = vrot.lane.b32.xlu1 %v3056_v32, %s3157_s9 }
 0x38d   :  { %3062 = vrot.lane.b32.xlu1 %v3061_v33, %s3157_s9 }
 0x391   :  { %3067 = vrot.lane.b32.xlu1 %v3066_v34, %s3157_s9 }
 0x395   :  { %3072 = vrot.lane.b32.xlu1 %v3036_v30, %s3155_s7 }
 0x399   :  { %2103 = vrot.lane.b32.xlu1 %v3301_v26, %s3155_s7 }
 0x39d   :  { %3082 = vrot.lane.b32.xlu1 %v3046_v31, %s3155_s7 }
 0x3e3   :  { %v3038_v38 = vpop.permute.xlu1 %3037 }
 0x3e4   :  { %v3040_v39 = vunpack.i.h.bf16 %v3038_v38  ;;  %v3039_v40 = vunpack.i.l.bf16 %v3038_v38 }
 0x3e6   :  { %v1375_v43 = vsel %vm1368_vm3, %v3039_v40, %v3040_v39 }
 0x3e7   :  { %v1357_v48 = vpop.permute.xlu1 %1356  ;;  %v1393_v49 = vsel %vm3326_vm4, %v1375_v43, 0.0 }
 0x3e8   :  { %v1374_v52 = vsel %vm1368_vm3, %v3040_v39, %v1357_v48  ;;  %v1403_v54 = vpack.c.bf16 %v1393_v49, %v1393_v49 }
 0x3e9   :  { %v1394_v56 = vsel %vm3334_vm5, %v1374_v52, 0.0 }
 0x3ea   :  { %v1404_v60 = vpack.c.bf16 %v1394_v56, %v1394_v56  ;;  %v1421_v3 = vsel %vm1419_vm6, %v1403_v54, 0  ;;  %v1347_v54 = vpack.c.bf16 %v3291_v23, %v3291_v23  ;;  %v1346_v56 = vpack.c.bf16 %v3301_v26, %v3301_v26  ;;  %v3091_v26 = vld [vmem:[%s3668_s2] sm:$0xff]  }
 0x3eb   :  { %v3043_v62 = vpop.permute.xlu1 %3042 }
 0x3ec   :  { %v3045_v1 = vunpack.i.h.bf16 %v3043_v62  ;;  %v3044_v2 = vunpack.i.l.bf16 %v3043_v62  ;;  %2887 = vmatprep.subr.msk.bf16.mxu0 %vm1419_vm6, %v1404_v60  ;;  %v1631_v60 = vsel %vm1419_vm6, %v1346_v56, 0  ;;  %v1348_v62 = vpack.c.bf16 %v3293_v9, %v3293_v9 }
 0x3ed   :  { %1445 = vmatpush1.bf16.msra.mxu0 %v1421_v3  ;;  %v1350_v9 = vpack.c.bf16 %v3305_v28, %v3305_v28 }
 0x3ee   :  { %v1372_v12 = vsel %vm1368_vm3, %v3044_v2, %v3045_v1  ;;  %v1373_v13 = vsel %vm1368_vm3, %v1357_v48, %v3044_v2  ;;  %v1345_v48 = vpack.c.bf16 %v3297_v25, %v3297_v25 }
 0x3ef   :  { %v1396_v16 = vsel %vm3359_vm8, %v1372_v12, 0.0  ;;  %v3048_v18 = vpop.permute.xlu1 %3047  ;;  %v1395_v19 = vsel %vm3355_vm7, %v1373_v13, 0.0  ;;  %v1643_v28 = vsel %vm1419_vm6, %v1350_v9, 0 }
 0x3f0   :  { %v3050_v20 = vunpack.i.h.bf16 %v3048_v18  ;;  %v3049_v21 = vunpack.i.l.bf16 %v3048_v18  ;;  %2888 = vmatmul.mubr.msk.bf16.vlgmr.msra.gmra.mrb[12].mxu0 %vm1010_vm2, %v3090_v4  ;;  %v1406_v22 = vpack.c.bf16 %v1396_v16, %v1396_v16  ;;  %v1405_v7 = vpack.c.bf16 %v1395_v19, %v1395_v19 }
 0x3f1   :  { %1562 = vmatprep.mubr.bf16.mxu0 %v3153_v44 }
 0x3f2   :  { %v1370_v30 = vsel %vm1368_vm3, %v3049_v21, %v3050_v20  ;;  %v1371_v31 = vsel %vm1368_vm3, %v3045_v1, %v3049_v21  ;;  %2889 = vmatprep.subr.msk.bf16.mxu1 %vm1419_vm6, %v1406_v22  ;;  %v1427_v33 = vsel %vm1419_vm6, %v1405_v7, 0 }
 0x3f3   :  { %v1398_v34 = vsel %vm3370_vm9, %v1370_v30, 0.0  ;;  %v1367_v35 = vpop.permute.xlu1 %1366  ;;  %1488 = vmatpush1.bf16.msra.mxu1 %v1427_v33  ;;  %v1397_v36 = vsel %vm3376_vm10, %v1371_v31, 0.0  ;;  %v3078_v31 = vpop.permute.xlu0 %3077 }
 0x3f4   :  { %v1369_v37 = vsel %vm1368_vm3, %v3050_v20, %v1367_v35  ;;  %v1376_v38 = vsel %vm1368_vm3, %v1367_v35, %v3039_v40  ;;  %v1408_v39 = vpack.c.bf16 %v1398_v34, %v1398_v34  ;;  %v1407_v57 = vpack.c.bf16 %v1397_v36, %v1397_v36 }
 0x3f5   :  { %v1399_v42 = vsel %vm3381_vm11, %v1369_v37, 0.0  ;;  %v1400_v43 = vsel %vm3391_vm12, %v1376_v38, 0.0  ;;  %v1344_v40 = vpack.c.bf16 %v3295_v24, %v3295_v24 }
 0x3f6   :  { %v1409_v49 = vpack.c.bf16 %v1399_v42, %v1399_v42  ;;  %v1410_v50 = vpack.c.bf16 %v1400_v43, %v1400_v43  ;;  %2890 = vmatmul.mubr.msk.bf16.vlgmr.msra.gmra.mrb[12].mxu1 %vm1010_vm2, %v3090_v4  ;;  %2891 = vmatprep.subr.msk.bf16.mxu0 %vm1419_vm6, %v1408_v39  ;;  %v1433_v51 = vsel %vm1419_vm6, %v1407_v57, 0  ;;  %v3080_v57 = vunpack.i.h.bf16 %v3078_v31 }
 0x3f7   :  { %v3053_v52 = vpop.permute.xlu1 %3052  ;;  %1531 = vmatpush1.bf16.msra.mxu0 %v1433_v51  ;;  %1605 = vmatprep.mubr.bf16.mxu1 %v3153_v44  ;;  %v1625_v24 = vsel %vm1419_vm6, %v1344_v40, 0  ;;  %v3079_v42 = vunpack.i.l.bf16 %v3078_v31  ;;  %v3092_v51 = vld [vmem:[%s3668_s2 + $0x10] sm:$0xff]  }
 0x3f8   :  { %2893 = vmatprep.subr.msk.bf16.mxu1 %vm1419_vm6, %v1410_v50  ;;  %2896 = vmatprep.subr.msk.bf16.mxu0 %vm1419_vm6, %v1345_v48  ;;  %v1439_v25 = vsel %vm1419_vm6, %v1409_v49, 0  ;;  %v3055_v23 = vunpack.i.h.bf16 %v3053_v52  ;;  %v3054_v63 = vunpack.i.l.bf16 %v3053_v52 }
 0x3f9   :  { %1574 = vmatpush1.bf16.msra.mxu1 %v1439_v25 }
 0x3fa   :  { %2892 = vmatmul.mubr.msk.bf16.vlgmr.msra.gmra.mrb[16].mxu0 %vm1010_vm2, %v3090_v4  ;;  %2898 = vmatprep.subr.msk.bf16.mxu1 %vm1419_vm6, %v1347_v54  ;;  %v1843_v13 = vsel %vm1836_vm13, %v3054_v63, %v3055_v23 }
 0x3fb   :  { %v3058_v58 = vpop.permute.xlu1 %3057  ;;  %1649 = vmatpush1.bf16.msra.mxu0 %v1625_v24  ;;  %1680 = vmatprep.mubr.bf16.mxu0 %v3153_v44  ;;  %v1871_v20 = vpack.c.bf16 %v1843_v13, %v1843_v13  ;;  %v2119_v24 = vsel %vm2115_vm15, %v3079_v42, %v3080_v57  ;;  %v3093_v13 = vld [vmem:[%s3668_s2 + $0x18] sm:$0xff]   ;;  %s3158_s2 = smov 2  }
 0x3fc   :  { %v3059_v59 = vunpack.i.l.bf16 %v3058_v58  ;;  %2900 = vmatprep.subr.msk.bf16.mxu0 %vm1419_vm6, %v1349_v55  ;;  %v3060_v3 = vunpack.i.h.bf16 %v3058_v58 }
 0x3fd   :  { %v1888_v35 = vsel %vm1419_vm6, %v1871_v20, 0 }
 0x3fe   :  { %2894 = vmatmul.mubr.msk.bf16.vlgmr.msra.gmra.mrb[16].mxu1 %vm1010_vm2, %v3090_v4  ;;  %v1842_v0 = vsel %vm1836_vm13, %v3055_v23, %v3059_v59  ;;  %v1637_v4 = vsel %vm1419_vm6, %v1348_v62, 0  ;;  %v1841_v7 = vsel %vm1836_vm13, %v3059_v59, %v3060_v3 }
 0x3ff   :  { %1692 = vmatpush1.bf16.msra.mxu1 %v1631_v60  ;;  %v3063_v1 = vpop.permute.xlu1 %3062  ;;  %1723 = vmatprep.mubr.bf16.mxu1 %v3153_v44  ;;  %v1872_v10 = vpack.c.bf16 %v1842_v0, %v1842_v0  ;;  %v1873_v36 = vpack.c.bf16 %v1841_v7, %v1841_v7  ;;  %v2143_v60 = vsel %vm3359_vm8, %v2119_v24, 0.0 }
 0x400   :  { %v3064_v2 = vunpack.i.l.bf16 %v3063_v1  ;;  %2902 = vmatprep.subr.msk.bf16.mxu1 %vm1419_vm6, %v1351_v27  ;;  %v3065_v18 = vunpack.i.h.bf16 %v3063_v1  ;;  %v2153_v11 = vpack.c.bf16 %v2143_v60, %v2143_v60  ;;  %v2114_v1 = vpop.permute.xlu0 %2113 }
 0x401   :  { %v1894_v49 = vsel %vm1419_vm6, %v1873_v36, 0 }
 0x402   :  { %2897 = vmatmul.mubr.msk.bf16.vlgmr.msra.gmra.mrb[12].mxu0 %vm1010_vm2, %v3091_v26  ;;  %v1840_v8 = vsel %vm1836_vm13, %v3060_v3, %v3064_v2  ;;  %v1839_v39 = vsel %vm1836_vm13, %v3064_v2, %v3065_v18 }
 0x403   :  { %1735 = vmatpush1.bf16.msra.mxu0 %v1637_v4  ;;  %v3068_v12 = vpop.permute.xlu1 %3067  ;;  %1766 = vmatprep.mubr.bf16.mxu0 %v3153_v44  ;;  %v1874_v19 = vpack.c.bf16 %v1840_v8, %v1840_v8  ;;  %v1875_v40 = vpack.c.bf16 %v1839_v39, %v1839_v39 }
 0x404   :  { %v3070_v14 = vunpack.i.h.bf16 %v3068_v12  ;;  %v3069_v16 = vunpack.i.l.bf16 %v3068_v12  ;;  %2905 = vmatprep.subr.msk.bf16.mxu0 %vm1419_vm6, %v1872_v10 }
 0x405   :  { %v1900_v45 = vsel %vm1419_vm6, %v1875_v40, 0 }
 0x406   :  { %2899 = vmatmul.mubr.msk.bf16.vlgmr.msra.gmra.mrb[12].mxu1 %vm1010_vm2, %v3091_v26  ;;  %v1838_v21 = vsel %vm1836_vm13, %v3065_v18, %v3069_v16  ;;  %v1844_v30 = vsel %vm1836_vm13, %v3070_v14, %v3054_v63  ;;  %v1837_v54 = vsel %vm1836_vm13, %v3069_v16, %v3070_v14 }
 0x407   :  { %1778 = vmatpush1.bf16.msra.mxu1 %v1643_v28  ;;  %v3073_v22 = vpop.permute.xlu1 %3072  ;;  %1809 = vmatprep.mubr.bf16.mxu1 %v3153_v44  ;;  %v1876_v33 = vpack.c.bf16 %v1838_v21, %v1838_v21  ;;  %v1868_v37 = vsel %vm1229_vm14, %v1844_v30, 0.0  ;;  %v1877_v23 = vpack.c.bf16 %v1837_v54, %v1837_v54 }
 0x408   :  { %2907 = vmatprep.subr.msk.bf16.mxu1 %vm1419_vm6, %v1874_v19  ;;  %v3075_v34 = vunpack.i.h.bf16 %v3073_v22  ;;  %v3074_v43 = vunpack.i.l.bf16 %v3073_v22  ;;  %v1878_v50 = vpack.c.bf16 %v1868_v37, %v1868_v37 }
 0x409   :  { %v1906_v63 = vsel %vm1419_vm6, %v1877_v23, 0 }
 0x40a   :  { %2901 = vmatmul.mubr.msk.bf16.vlgmr.msra.gmra.mrb[16].mxu0 %vm1010_vm2, %v3091_v26  ;;  %v2122_v55 = vsel %vm2115_vm15, %v3074_v43, %v3075_v34  ;;  %v2123_v3 = vsel %vm2115_vm15, %v2114_v1, %v3074_v43 }
 0x40b   :  { %1912 = vmatpush1.bf16.msra.mxu0 %v1888_v35  ;;  %v2104_v38 = vpop.permute.xlu1 %2103  ;;  %1943 = vmatprep.mubr.bf16.mxu0 %v3153_v44  ;;  %v2140_v27 = vsel %vm3326_vm4, %v2122_v55, 0.0  ;;  %v2147_v9 = vsel %vm1341_vm0, %v2123_v3, 0.0 }
 0x40c   :  { %v2121_v48 = vsel %vm2115_vm15, %v3075_v34, %v2104_v38  ;;  %2909 = vmatprep.subr.msk.bf16.mxu0 %vm1419_vm6, %v1876_v33  ;;  %v2150_v0 = vpack.c.bf16 %v2140_v27, %v2140_v27  ;;  %v2157_v12 = vpack.c.bf16 %v2147_v9, %v2147_v9 }
 0x40d   :  { %v2141_v52 = vsel %vm3334_vm5, %v2121_v48, 0.0 }
 0x40e   :  { %2903 = vmatmul.mubr.msk.bf16.vlgmr.msra.gmra.mrb[16].mxu1 %vm1010_vm2, %v3091_v26  ;;  %v2151_v59 = vpack.c.bf16 %v2141_v52, %v2141_v52  ;;  %v2120_v26 = vsel %vm2115_vm15, %v2104_v38, %v3079_v42  ;;  %v2167_v17 = vsel %vm1419_vm6, %v2150_v0, 0 }
 0x40f   :  { %1955 = vmatpush1.bf16.msra.mxu1 %v1894_v49  ;;  %v3083_v25 = vpop.permute.xlu1 %3082  ;;  %1986 = vmatprep.mubr.bf16.mxu1 %v3153_v44  ;;  %v2142_v2 = vsel %vm3355_vm7, %v2120_v26, 0.0 }
 0x410   :  { %v3085_v56 = vunpack.i.h.bf16 %v3083_v25  ;;  %v3084_v58 = vunpack.i.l.bf16 %v3083_v25  ;;  %2911 = vmatprep.subr.msk.bf16.mxu1 %vm1419_vm6, %v1878_v50  ;;  %v2152_v5 = vpack.c.bf16 %v2142_v2, %v2142_v2 }
 0x412   :  { %2906 = vmatmul.mubr.msk.bf16.vlgmr.msra.gmra.mrb[12].mxu0 %vm1010_vm2, %v3092_v51  ;;  %v2117_v62 = vsel %vm2115_vm15, %v3084_v58, %v3085_v56  ;;  %v2118_v10 = vsel %vm2115_vm15, %v3080_v57, %v3084_v58  ;;  %v2116_v32 = vsel %vm2115_vm15, %v3085_v56, %v2114_v1  ;;  %v2173_v8 = vsel %vm1419_vm6, %v2152_v5, 0 }
 0x413   :  { %1998 = vmatpush1.bf16.msra.mxu0 %v1900_v45  ;;  %2029 = vmatprep.mubr.bf16.mxu0 %v3153_v44  ;;  %v2145_v41 = vsel %vm3370_vm9, %v2117_v62, 0.0  ;;  %v2144_v61 = vsel %vm3376_vm10, %v2118_v10, 0.0  ;;  %v2146_v15 = vsel %vm3381_vm11, %v2116_v32, 0.0 }
 0x414   :  { %2914 = vmatprep.subr.msk.bf16.mxu0 %vm1419_vm6, %v2151_v59  ;;  %v2155_v4 = vpack.c.bf16 %v2145_v41, %v2145_v41  ;;  %v2154_v14 = vpack.c.bf16 %v2144_v61, %v2144_v61  ;;  %v2156_v18 = vpack.c.bf16 %v2146_v15, %v2146_v15 }
 0x416   :  { %2908 = vmatmul.mubr.msk.bf16.vlgmr.msra.gmra.mrb[12].mxu1 %vm1010_vm2, %v3092_v51  ;;  %v2179_v16 = vsel %vm1419_vm6, %v2154_v14, 0  ;;  %v2185_v19 = vsel %vm1419_vm6, %v2156_v18, 0 }
 0x417   :  { %2041 = vmatpush1.bf16.msra.mxu1 %v1906_v63  ;;  %2072 = vmatprep.mubr.bf16.mxu1 %v3153_v44 }
 0x418   :  { %2916 = vmatprep.subr.msk.bf16.mxu1 %vm1419_vm6, %v2153_v11 }
 0x41a   :  { %2910 = vmatmul.mubr.msk.bf16.vlgmr.msra.gmra.mrb[16].mxu0 %vm1010_vm2, %v3092_v51 }
 0x41b   :  { %2191 = vmatpush1.bf16.msra.mxu0 %v2167_v17  ;;  %2222 = vmatprep.mubr.bf16.mxu0 %v3153_v44 }
 0x41c   :  { %2918 = vmatprep.subr.msk.bf16.mxu0 %vm1419_vm6, %v2155_v4 }
 0x41e   :  { %2912 = vmatmul.mubr.msk.bf16.vlgmr.msra.gmra.mrb[16].mxu1 %vm1010_vm2, %v3092_v51 }
 0x41f   :  { %2234 = vmatpush1.bf16.msra.mxu1 %v2173_v8  ;;  %2265 = vmatprep.mubr.bf16.mxu1 %v3153_v44 }
 0x420   :  { %2920 = vmatprep.subr.msk.bf16.mxu1 %vm1419_vm6, %v2157_v12 }
 0x422   :  { %2915 = vmatmul.mubr.msk.bf16.vlgmr.msra.gmra.mrb[12].mxu0 %vm1010_vm2, %v3093_v13 }
 0x423   :  { %2277 = vmatpush1.bf16.msra.mxu0 %v2179_v16  ;;  %2308 = vmatprep.mubr.bf16.mxu0 %v3153_v44 }
 0x426   :  { %2917 = vmatmul.mubr.msk.bf16.vlgmr.msra.gmra.mrb[12].mxu1 %vm1010_vm2, %v3093_v13 }
 0x427   :  { %2320 = vmatpush1.bf16.msra.mxu1 %v2185_v19  ;;  %2351 = vmatprep.mubr.bf16.mxu1 %v3153_v44 }
 0x42a   :  { %2919 = vmatmul.mubr.msk.bf16.vlgmr.msra.gmra.mrb[16].mxu0 %vm1010_vm2, %v3093_v13 }
 0x42e   :  { %2921 = vmatmul.mubr.msk.bf16.vlgmr.msra.gmra.mrb[16].mxu1 %vm1010_vm2, %v3093_v13 }
 0x4f5   :  { %v3544_v29 = vpop.f32.mrb[12].mxu0 }
 0x4f6   :  { %v2519_v28 = vmul.f32 %v3544_v29, %v3544_v29  ;;  %v3548_v20 = vpop.f32.mrb[13].mxu0 }
 0x4f7   :  { %v2378_v21 = vadd.f32 %v3548_v20, %v3544_v29  ;;  %v2520_v22 = vmul.f32 %v3548_v20, %v3548_v20  ;;  %v3554_v7 = vpop.f32.mrb[14].mxu0 }
 0x4f8   :  { %v2527_v44 = vmul.f32 %v3554_v7, %v3554_v7  ;;  %v3558_v30 = vpop.f32.mrb[15].mxu0 }
 0x4f9   :  { %v2535_v31 = vadd.f32 %v2520_v22, %v2519_v28  ;;  %v2387_v33 = vadd.f32 %v3558_v30, %v3554_v7  ;;  %v2528_v34 = vmul.f32 %v3558_v30, %v3558_v30  ;;  %v3564_v35 = vpop.f32.mrb[12].mxu1  ;;  %v2401_v28 = vand.u32 7, %v3264_v46 }
 0x4fa   :  { %v2379_v36 = vadd.f32 %v2378_v21, %v3564_v35  ;;  %v2521_v37 = vmul.f32 %v3564_v35, %v3564_v35  ;;  %v3569_v38 = vpop.f32.mrb[13].mxu1  ;;  %v2425_v21 = vand.u32 7, %v3266_v47 }
 0x4fb   :  { %v2544_v39 = vadd.f32 %v2528_v34, %v2527_v44  ;;  %v2522_v57 = vmul.f32 %v3569_v38, %v3569_v38  ;;  %v3573_v42 = vpop.f32.mrb[14].mxu1  ;;  %v2396_v44 = vadd.s32 8, %v3264_v46 }
 0x4fc   :  { %v2536_v43 = vadd.f32 %v2535_v31, %v2521_v37  ;;  %v2380_v48 = vadd.f32 %v2379_v36, %v3569_v38  ;;  %v2388_v49 = vadd.f32 %v2387_v33, %v3573_v42  ;;  %v2529_v50 = vmul.f32 %v3573_v42, %v3573_v42  ;;  %v3579_v51 = vpop.f32.mrb[15].mxu1 }
 0x4fd   :  { %v2530_v40 = vmul.f32 %v3579_v51, %v3579_v51  ;;  %v3583_v52 = vpop.f32.mrb[16].mxu0  ;;  %vm2433_vm2 = vcmp.eq.s32.totalorder %v2401_v28, %v2425_v21  ;;  %v2408_v31 = vand.u32 7, %v2396_v44 }
 0x4fe   :  { %v2537_v25 = vadd.f32 %v2536_v43, %v2522_v57  ;;  %v2545_v54 = vadd.f32 %v2544_v39, %v2529_v50  ;;  %v2389_v24 = vadd.f32 %v2388_v49, %v3579_v51  ;;  %v2381_v55 = vadd.f32 %v2380_v48, %v3583_v52  ;;  %v3587_v56 = vpop.f32.mrb[17].mxu0 }
 0x4ff   :  { %v2523_v58 = vmul.f32 %v3583_v52, %v3583_v52  ;;  %v2524_v59 = vmul.f32 %v3587_v56, %v3587_v56  ;;  %v3593_v45 = vpop.f32.mrb[18].mxu0  ;;  %v2435_v22 = vsel %vm2433_vm2, 0.00048828125, %v3151_v6  ;;  %vm2434_vm3 = vcmp.eq.s32.totalorder %v2408_v31, %v2425_v21 }
 0x500   :  { %v2546_v23 = vadd.f32 %v2545_v54, %v2530_v40  ;;  %v2382_v60 = vadd.f32 %v2381_v55, %v3587_v56  ;;  %v2390_v27 = vadd.f32 %v2389_v24, %v3593_v45  ;;  %v2531_v26 = vmul.f32 %v3593_v45, %v3593_v45  ;;  %v3599_v62 = vpop.f32.mrb[19].mxu0  ;;  %2952 = vmatprep.mubr.msk.f32.mxu0 %vm2437_vm1, %v2435_v22 }
 0x501   :  { %v2538_v63 = vadd.f32 %v2537_v25, %v2523_v58  ;;  %v2532_v11 = vmul.f32 %v3599_v62, %v3599_v62  ;;  %v3603_v0 = vpop.f32.mrb[16].mxu1  ;;  %2959 = vmatprep.mubr.msk.f32.mxu1 %vm2437_vm1, %v2435_v22  ;;  %v2436_v47 = vsel %vm2434_vm3, 0.00048828125, %v3151_v6 }
 0x502   :  { %v2547_v1 = vadd.f32 %v2546_v23, %v2531_v26  ;;  %v2391_v2 = vadd.f32 %v2390_v27, %v3599_v62  ;;  %v2525_v41 = vmul.f32 %v3603_v0, %v3603_v0  ;;  %v3608_v3 = vpop.f32.mrb[17].mxu1  ;;  %v2383_v10 = vadd.f32 %v2382_v60, %v3603_v0  ;;  %v34_v60 = vld [vmem:[%s3669_s3 + $0x8] sm:$0xff]  ;;  %s3161_s3 = smov [#allocation5]  }
 0x503   :  { %v3611_v5 = vpop.f32.mrb[18].mxu1  ;;  %v2526_v17 = vmul.f32 %v3608_v3, %v3608_v3  ;;  %v2539_v4 = vadd.f32 %v2538_v63, %v2524_v59  ;;  %v3159_v59 = vmov 2   ;;  %v3160_v23 = vmov 3   ;;  %s2744_s20 = sshll.u32 %s3161_s3, 4  ;;  %s2745_s20 = int_to_ptr.vmem [resolvable:$true] %s2744_s20 }
 0x504   :  { %v2533_v9 = vmul.f32 %v3611_v5, %v3611_v5  ;;  %v3617_v61 = vpop.f32.mrb[19].mxu1  ;;  %v2384_v32 = vadd.f32 %v2383_v10, %v3608_v3  ;;  %v2392_v8 = vadd.f32 %v2391_v2, %v3611_v5  ;;  %v2548_v12 = vadd.f32 %v2547_v1, %v2532_v11  ;;  %s3122_s21 = scalar_lea.vmem %s2745_s20, 2048  ;;  %p3127_p9 = scmp.lt.s32.totalorder %s2745_s20, %s2745_s20 }
 0x505   :  { %v2534_v13 = vmul.f32 %v3617_v61, %v3617_v61  ;;  %v2540_v14 = vadd.f32 %v2539_v4, %v2525_v41  ;;  %p3123_p8 = scmp.ne.s32.totalorder %s2745_s20, %s3122_s21  ;;  %p3128_p10 = scmp.lt.s32.totalorder %s3122_s21, %s3122_s21 }
 0x506   :  { %2385 = vadd.xlane.f32.xlu1 %v2384_v32  ;;  %v2393_v15 = vadd.f32 %v2392_v8, %v3617_v61  ;;  %v2549_v16 = vadd.f32 %v2548_v12, %v2533_v9 }
 0x507   :  { %v2541_v18 = vadd.f32 %v2540_v14, %v2526_v17  ;;  %p3129_p11 = por %p3128_p10, %p3127_p9 }
 0x508   :  { %2394 = vadd.xlane.f32.xlu0 %v2393_v15  ;;  %v2550_v19 = vadd.f32 %v2549_v16, %v2534_v13 }
 0x509   :  { %p3130_p12 = pnand %p3129_p11, %p3123_p8 }
 0x50a   :  { %2551 = vadd.xlane.f32.xlu1 %v2550_v19 }
 0x50c   :  { %2542 = vadd.xlane.f32.xlu0 %v2541_v18 }
 0x593   :  { %v2386_v33 = vpop.xlane.xlu1 %2385 }
 0x595   :  { %v2395_v34 = vpop.xlane.xlu0 %2394 }
 0x596   :  { %v2962_v36 = vpack.c.bf16 %v2395_v34, %v2386_v33 }
 0x597   :  { %v2552_v37 = vpop.xlane.xlu1 %2551 }
 0x598   :  { %2963 = vmatprep.subr.bf16.mxu0 %v2962_v36 }
 0x599   :  { %2965 = vmatpush3.bf16.msra.mxu0 %v2962_v36  ;;  %v2543_v39 = vpop.xlane.xlu0 %2542 }
 0x59a   :  { %v2966_v57 = vpack.c.bf16 %v2552_v37, %v2543_v39 }
 0x59c   :  { %2967 = vmatprep.subr.bf16.mxu1 %v2966_v57  ;;  %2953 = vmatmul.mubr.msk.f32.vlgmr.msra.gmra.mrb[10].mxu0 %vm2437_vm1, %v2436_v47 }
 0x59d   :  { %2969 = vmatpush3.bf16.msra.mxu1 %v2966_v57 }
 0x5a0   :  { %2960 = vmatmul.mubr.msk.f32.vlgmr.msra.gmra.mrb[10].mxu1 %vm2437_vm1, %v2436_v47 }
 0x66f   :  { %v2954_v43 = vpop.f32.mrb[10].mxu0 }
 0x670   :  { %v2629_v46 = vmul.f32 %v2954_v43, %v2954_v43  ;;  %v2510_v48 = vpop.f32.mrb[11].mxu0 }
 0x671   :  { %v2628_v49 = vmul.f32 %v2510_v48, %v2510_v48 }
 0x673   :  { %v2961_v50 = vpop.f32.mrb[10].mxu1 }
 0x674   :  { %v2631_v40 = vsub.f32 %v2961_v50, %v2629_v46  ;;  %v2619_v25 = vpop.f32.mrb[11].mxu1 }
 0x675   :  { %v2630_v54 = vsub.f32 %v2619_v25, %v2628_v49 }
 0x676   :  { %v2633_v24 = vadd.f32 1e-05, %v2631_v40 }
 0x677   :  { %v2632_v55 = vadd.f32 1e-05, %v2630_v54 }
 0x678   :  { %3096 = vrsqrt.f32 %v2633_v24 }
 0x679   :  { %3098 = vrsqrt.f32 %v2632_v55 }
 0x682   :  { %v3097_v6 = vpop.eup %3096 }
 0x683   :  { %v3099_v58 = vpop.eup %3098  ;;  %2640 = vrot.lane.b32.xlu1 %v3097_v6, %s3158_s2 }
 0x684   :  { %2638 = vrot.lane.b32.xlu0 %v3099_v58, %s3158_s2 }
 0x687   :  { %2648 = vperm.xlu1 %3034, %v2510_v48  }
 0x688   :  { %2653 = vperm.xlu0 %3086, %v2954_v43  }
 0x68b   :  { %3087 = vset.pattern.permute.xlu1 %v3159_v59 }
 0x68c   :  { %3088 = vset.pattern.permute.xlu0 %v3160_v23 }
 0x68d   :  { %2699 = vperm.xlu0 %3088, %v3278_v53  }
 0x6f5   :  { %v2641_v27 = vpop.permute.xlu1 %2640 }
 0x6f6   :  { %v2645_v26 = vmul.f32 %v2641_v27, %v34_v60  ;;  %v2639_v63 = vpop.permute.xlu0 %2638 }
 0x6f7   :  { %v2644_v11 = vmul.f32 %v2639_v63, %v3278_v53 }
 0x6f8   :  { %2679 = vperm.xlu1 %3087, %v2645_v26  }
 0x6fc   :  { %2674 = vperm.xlu1 %3087, %v2644_v11  }
 0x700   :  { %3089 = vset.pattern.permute.xlu1 %v3160_v23 }
 0x701   :  { %2704 = vperm.xlu1 %3089, %v34_v60  }
 0x706   :  { %v2649_v1 = vpop.permute.xlu1 %2648 }
 0x707   :  { %v2654_v2 = vpop.permute.xlu0 %2653  ;;  %v2656_v10 = vsub.f32 %v3544_v29, %v2649_v1  ;;  %v2657_v17 = vsub.f32 %v3548_v20, %v2649_v1  ;;  %v2658_v4 = vsub.f32 %v3564_v35, %v2649_v1  ;;  %v2659_v9 = vsub.f32 %v3569_v38, %v2649_v1 }
 0x708   :  { %v2660_v32 = vsub.f32 %v3583_v52, %v2649_v1  ;;  %v2661_v8 = vsub.f32 %v3587_v56, %v2649_v1  ;;  %v2662_v53 = vsub.f32 %v3603_v0, %v2649_v1  ;;  %v2663_v12 = vsub.f32 %v3608_v3, %v2649_v1 }
 0x709   :  { %v2664_v13 = vsub.f32 %v3554_v7, %v2654_v2  ;;  %v2665_v14 = vsub.f32 %v3558_v30, %v2654_v2  ;;  %v2666_v29 = vsub.f32 %v3573_v42, %v2654_v2  ;;  %v2667_v20 = vsub.f32 %v3579_v51, %v2654_v2 }
 0x70a   :  { %v2668_v35 = vsub.f32 %v3593_v45, %v2654_v2  ;;  %v2669_v38 = vsub.f32 %v3599_v62, %v2654_v2  ;;  %v2670_v52 = vsub.f32 %v3611_v5, %v2654_v2  ;;  %v2671_v56 = vsub.f32 %v3617_v61, %v2654_v2 }
 0x70c   :  { %v2700_v0 = vpop.permute.xlu0 %2699 }
 0x777   :  { %v2680_v41 = vpop.permute.xlu1 %2679 }
 0x778   :  { %v2690_v16 = vmul.f32 %v2680_v41, %v2664_v13  ;;  %v2691_v3 = vmul.f32 %v2680_v41, %v2665_v14  ;;  %v2692_v18 = vmul.f32 %v2680_v41, %v2666_v29  ;;  %v2693_v7 = vmul.f32 %v2680_v41, %v2667_v20 }
 0x779   :  { %v2694_v39 = vmul.f32 %v2680_v41, %v2668_v35  ;;  %v2695_v47 = vmul.f32 %v2680_v41, %v2669_v38  ;;  %v2696_v57 = vmul.f32 %v2680_v41, %v2670_v52  ;;  %v2697_v43 = vmul.f32 %v2680_v41, %v2671_v56 }
 0x77b   :  { %v2675_v15 = vpop.permute.xlu1 %2674 }
 0x77c   :  { %v2682_v19 = vmul.f32 %v2675_v15, %v2656_v10  ;;  %v2683_v30 = vmul.f32 %v2675_v15, %v2657_v17  ;;  %v2684_v28 = vmul.f32 %v2675_v15, %v2658_v4  ;;  %v2685_v42 = vmul.f32 %v2675_v15, %v2659_v9 }
 0x77d   :  { %v2686_v21 = vmul.f32 %v2675_v15, %v2660_v32  ;;  %v2687_v51 = vmul.f32 %v2675_v15, %v2661_v8  ;;  %v2688_v22 = vmul.f32 %v2675_v15, %v2662_v53  ;;  %v2689_v45 = vmul.f32 %v2675_v15, %v2663_v12 }
 0x77e   :  { %v2707_v44 = vadd.f32 %v2700_v0, %v2682_v19  ;;  %v2708_v62 = vadd.f32 %v2700_v0, %v2683_v30  ;;  %v2709_v31 = vadd.f32 %v2700_v0, %v2684_v28  ;;  %v2710_v5 = vadd.f32 %v2700_v0, %v2685_v42 }
 0x77f   :  { %v2711_v33 = vadd.f32 %v2700_v0, %v2686_v21  ;;  %v2712_v61 = vadd.f32 %v2700_v0, %v2687_v51  ;;  %v2713_v34 = vadd.f32 %v2700_v0, %v2688_v22  ;;  %v2714_v36 = vadd.f32 %v2700_v0, %v2689_v45 }
 0x780   :  { %2723 = vst [vmem:[#allocation5] sm:$0xff] %v2707_v44  ;;  %2724 = vst [vmem:[#allocation5 + $0x8] sm:$0xff] %v2708_v62  ;;  %v2705_v37 = vpop.permute.xlu1 %2704 }
 0x781   :  { %2725 = vst [vmem:[#allocation5 + $0x10] sm:$0xff] %v2709_v31  ;;  %2726 = vst [vmem:[#allocation5 + $0x18] sm:$0xff] %v2710_v5  ;;  %v2715_v46 = vadd.f32 %v2705_v37, %v2690_v16  ;;  %v2716_v48 = vadd.f32 %v2705_v37, %v2691_v3  ;;  %v2717_v49 = vadd.f32 %v2705_v37, %v2692_v18 }
 0x782   :  { %2727 = vst [vmem:[#allocation5 + $0x20] sm:$0xff] %v2711_v33  ;;  %2728 = vst [vmem:[#allocation5 + $0x28] sm:$0xff] %v2712_v61  ;;  %v2718_v50 = vadd.f32 %v2705_v37, %v2693_v7  ;;  %v2719_v40 = vadd.f32 %v2705_v37, %v2694_v39  ;;  %v2720_v25 = vadd.f32 %v2705_v37, %v2695_v47 }
 0x783   :  { %2729 = vst [vmem:[#allocation5 + $0x30] sm:$0xff] %v2713_v34  ;;  %2730 = vst [vmem:[#allocation5 + $0x38] sm:$0xff] %v2714_v36  ;;  %v2721_v54 = vadd.f32 %v2705_v37, %v2696_v57  ;;  %v2722_v24 = vadd.f32 %v2705_v37, %v2697_v43 }
 0x784   :  { %2731 = vst [vmem:[#allocation5 + $0x40] sm:$0xff] %v2715_v46  ;;  %2732 = vst [vmem:[#allocation5 + $0x48] sm:$0xff] %v2716_v48 }
 0x785   :  { %2733 = vst [vmem:[#allocation5 + $0x50] sm:$0xff] %v2717_v49  ;;  %2734 = vst [vmem:[#allocation5 + $0x58] sm:$0xff] %v2718_v50 }
 0x786   :  { %2735 = vst [vmem:[#allocation5 + $0x60] sm:$0xff] %v2719_v40  ;;  %2736 = vst [vmem:[#allocation5 + $0x68] sm:$0xff] %v2720_v25 }
 0x787   :  { %2737 = vst [vmem:[#allocation5 + $0x70] sm:$0xff] %v2721_v54  ;;  %2738 = vst [vmem:[#allocation5 + $0x78] sm:$0xff] %v2722_v24 }
 0x788   :  { %3133 = shalt.err (!%p3130_p12)
}
 0x789   :  { %s3134_s24 = scalar_lea.hbm %s3670_s4, 2048 }
 0x78a   :  { %p3135_p13 = scmp.ne.s32.totalorder %s3670_s4, %s3134_s24  ;;  %p3138_p0 = scmp.lt.u32.totalorder %s3134_s24, %s3670_s4 }
 0x78c   :  { %p3140_p1 = pnand %p3138_p0, %p3135_p13 }
 0x78e   :  { %3143 = shalt.err (!%p3140_p1)
}
 0x78f   :  { %s3162_s1 = smov 1024   ;;  %s3163_s29 = smov 64  }
 0x790   :  { %2750 = dma.vmem_to_hbm [thread:$0]  %s2745_s20, 2048, %s3670_s4, [#allocation4], %s3162_s1, %s3162_s1, %s3163_s29  }
 0x791   :  { %3146 = dma.done.wait [#allocation4], 2048  }
 0x792   :  { %3147 = vsyncadd [#allocation4], 4294965248 }
 0x793   :  { %2754 = vsyncpa [#allocation3], 1 }
 0x794   :  { %2755 = vsyncpa [#allocation4], 1 }

</bundles_post_ra>
